<compile_context>
chip_gen: v7x
topology: tpu7x:2x2x1
jax: 0.10.0
libtpu: 0.0.40
codegen_flags: <defaults>
</compile_context>

<pallas_src>
import functools

import jax
import jax.numpy as jnp
from jax.experimental import pallas as pl
from jax.experimental.pallas import tpu as pltpu

# Budget VMEM explicitly (v7x only has 64 MiB physical per TC).
_VMEM_LIMIT = 48 * 1024 * 1024


def _tile(dim, target, mult):
    """Largest divisor of `dim` that is <= target and a multiple of `mult`.
    Falls back to `dim` (a block equal to the full dimension is always legal)."""
    if dim <= target:
        return dim
    for t in range(target, 0, -1):
        if dim % t == 0 and t % mult == 0:
            return t
    return dim


# -------------------- generic tiled linear (M-tiled, K-reduction + accumulator) --------------------
def _linear_kernel(x_ref, w_ref, b_ref, o_ref, acc_ref, *, use_gelu):
    @pl.when(pl.program_id(1) == 0)
    def _():
        acc_ref[...] = jnp.zeros_like(acc_ref)

    acc_ref[...] += jnp.dot(x_ref[...], w_ref[...], preferred_element_type=jnp.float32)

    @pl.when(pl.program_id(1) == pl.num_programs(1) - 1)
    def _():
        r = acc_ref[...] + b_ref[...]
        if use_gelu:
            r = jax.nn.gelu(r, approximate=True)  # TODO(synk): torch default GELU is exact erf
        o_ref[...] = r


def pallas_linear(x2d, w, b, *, gelu=False):
    """x2d: [M, Kc], w: [Kc, N], b: broadcastable to [1, N] -> [M, N] float32."""
    M, Kc = x2d.shape
    N = w.shape[1]
    tm = _tile(M, 256, 8)
    tk = _tile(Kc, 512, 128)
    b2 = jnp.reshape(b, (1, N)).astype(jnp.float32)
    return pl.pallas_call(
        functools.partial(_linear_kernel, use_gelu=gelu),
        out_shape=jax.ShapeDtypeStruct((M, N), jnp.float32),
        grid=(M // tm, Kc // tk),
        in_specs=[
            pl.BlockSpec((tm, tk), lambda i, k: (i, k)),
            pl.BlockSpec((tk, N), lambda i, k: (k, 0)),
            pl.BlockSpec((1, N), lambda i, k: (0, 0)),
        ],
        out_specs=pl.BlockSpec((tm, N), lambda i, k: (i, 0)),
        scratch_shapes=[pltpu.VMEM((tm, N), jnp.float32)],
        compiler_params=pltpu.CompilerParams(
            dimension_semantics=("parallel", "arbitrary"),
            vmem_limit_bytes=_VMEM_LIMIT),
    )(x2d.astype(jnp.float32), w.astype(jnp.float32), b2)


# -------------------- stage 1: fused forward "SHT" + input projection (active modes) --------------------
def _grid_to_coeff_kernel(x_ref, sht_ref, win_ref, binc_ref, o_ref, acc_ref):
    # x: [tp, Cin]  sht: [modes, tp]  win: [Cin, H]  binc: [modes, H]  o: [modes, H]  acc: [modes, Cin]
    @pl.when(pl.program_id(1) == 0)
    def _():
        acc_ref[...] = jnp.zeros_like(acc_ref)

    # Accumulate S_head^T @ x over the P reduction (small [modes, Cin] accumulator).
    acc_ref[...] += jnp.dot(sht_ref[...], x_ref[...], preferred_element_type=jnp.float32)

    @pl.when(pl.program_id(1) == pl.num_programs(1) - 1)
    def _():
        o_ref[...] = (jnp.dot(acc_ref[...], win_ref[...], preferred_element_type=jnp.float32)
                      + binc_ref[...])


def grid_to_coeff(x_bpc, shtT_head, w_in, b_in_coeff):
    B, P, Cin = x_bpc.shape
    modes = shtT_head.shape[0]
    H = w_in.shape[1]
    tp = _tile(P, 2048, 128)   # lane dim of the sht block: multiple of 128 (or full P)
    return pl.pallas_call(
        _grid_to_coeff_kernel,
        out_shape=jax.ShapeDtypeStruct((B, modes, H), jnp.float32),
        grid=(B, P // tp),
        in_specs=[
            pl.BlockSpec((None, tp, Cin), lambda b, p: (b, p, 0)),
            pl.BlockSpec((modes, tp), lambda b, p: (0, p)),
            pl.BlockSpec((Cin, H), lambda b, p: (0, 0)),
            pl.BlockSpec((modes, H), lambda b, p: (0, 0)),
        ],
        out_specs=pl.BlockSpec((None, modes, H), lambda b, p: (b, 0, 0)),
        scratch_shapes=[pltpu.VMEM((modes, Cin), jnp.float32)],
        compiler_params=pltpu.CompilerParams(
            dimension_semantics=("parallel", "arbitrary"),
            vmem_limit_bytes=_VMEM_LIMIT),
    )(x_bpc, shtT_head, w_in, b_in_coeff)


# -------------------- stage 2: ALL SphericalFourierLayers fused, active modes only --------------------
def _sfno_layers_kernel(x_ref, wr_ref, bias_ref, lw_ref, lb_ref, o_ref):
    # x/o: [modes, H]   wr: [modes, H, H]   bias: [modes, H]   lw: [H, H]   lb: [1, H]
    modes = o_ref.shape[0]

    # Layer 0 reads the spectral coefficients; the output block is the resident carry.
    @pl.when(pl.program_id(1) == 0)
    def _():
        o_ref[...] = x_ref[...]

    lw = lw_ref[...]
    lb = lb_ref[...]
    # Each active mode is independent (per-mode mixing is diagonal in m), so in-place
    # row updates on o_ref are safe.  Static unroll -> plain 2-D MXU matmuls only.
    for m in range(modes):
        xm = o_ref[pl.ds(m, 1), :]                                       # [1, H]
        ym = (jnp.dot(xm, wr_ref[m], preferred_element_type=jnp.float32)
              + bias_ref[pl.ds(m, 1), :])
        zm = jnp.dot(ym, lw, preferred_element_type=jnp.float32) + lb
        o_ref[pl.ds(m, 1), :] = jax.nn.gelu(zm, approximate=True)  # TODO(synk): torch GELU is exact erf


def sfno_layers(head, wr_all, bias_head_all, lw_all, lb_all):
    B, modes, H = head.shape
    L = wr_all.shape[0]
    return pl.pallas_call(
        _sfno_layers_kernel,
        out_shape=jax.ShapeDtypeStruct((B, modes, H), jnp.float32),
        grid=(B, L),
        in_specs=[
            pl.BlockSpec((None, modes, H), lambda b, l: (b, 0, 0)),
            pl.BlockSpec((None, modes, H, H), lambda b, l: (l, 0, 0, 0)),
            pl.BlockSpec((None, modes, H), lambda b, l: (l, 0, 0)),
            pl.BlockSpec((None, H, H), lambda b, l: (l, 0, 0)),
            pl.BlockSpec((None, 1, H), lambda b, l: (l, 0, 0)),
        ],
        out_specs=pl.BlockSpec((None, modes, H), lambda b, l: (b, 0, 0)),
        compiler_params=pltpu.CompilerParams(
            dimension_semantics=("parallel", "arbitrary"),
            vmem_limit_bytes=_VMEM_LIMIT),
    )(head, wr_all, bias_head_all, lw_all, lb_all)


# -------------------- stage 3: fused output projection + inverse "SHT" --------------------
def _coeff_to_grid_kernel(head_ref, tail_ref, sh_ref, st_ref, wout_ref, bout_ref, o_ref):
    # head: [modes, H]  tail: [Kt, H]  sh: [tp, modes]  st: [tp, Kt]  wout: [H, Cout]  bout: [1, Cout]
    wout = wout_ref[...]
    hw = jnp.dot(head_ref[...], wout, preferred_element_type=jnp.float32)   # [modes, Cout]
    tw = jnp.dot(tail_ref[...], wout, preferred_element_type=jnp.float32)   # [Kt, Cout] (tiny)
    o_ref[...] = (jnp.dot(sh_ref[...], hw, preferred_element_type=jnp.float32)
                  + jnp.dot(st_ref[...], tw, preferred_element_type=jnp.float32)
                  + bout_ref[...])


def coeff_to_grid(head, tail, isht_head, isht_tail, w_out, b_out):
    B, modes, H = head.shape
    Kt = tail.shape[0]
    P = isht_head.shape[0]
    Cout = w_out.shape[1]
    tp = _tile(P, 2048, 8)
    return pl.pallas_call(
        _coeff_to_grid_kernel,
        out_shape=jax.ShapeDtypeStruct((B, P, Cout), jnp.float32),
        grid=(B, P // tp),
        in_specs=[
            pl.BlockSpec((None, modes, H), lambda b, p: (b, 0, 0)),
            pl.BlockSpec((Kt, H), lambda b, p: (0, 0)),
            pl.BlockSpec((tp, modes), lambda b, p: (p, 0)),
            pl.BlockSpec((tp, Kt), lambda b, p: (p, 0)),
            pl.BlockSpec((H, Cout), lambda b, p: (0, 0)),
            pl.BlockSpec((1, Cout), lambda b, p: (0, 0)),
        ],
        # NOTE: Cout (=3) lanes -> masked stores, but the output tensor is tiny; kept as-is.
        out_specs=pl.BlockSpec((None, tp, Cout), lambda b, p: (b, p, 0)),
        compiler_params=pltpu.CompilerParams(
            dimension_semantics=("parallel", "parallel"),
            vmem_limit_bytes=_VMEM_LIMIT),
    )(head, tail, isht_head, isht_tail, w_out, b_out)


# ---------------------------------- parameter setup --------------------------------------
def init_params(key, in_channels, hidden_dim, out_channels, lmax, nlat, nlon, num_layers):
    modes = lmax + 1
    K = (lmax + 1) ** 2
    P = nlat * nlon
    keys = jax.random.split(key, 5 + 4 * num_layers)
    it = iter(keys)

    def nrm(shape, std):
        return jax.random.normal(next(it), shape, jnp.float32) * jnp.float32(std)

    def unif(shape, lim):
        return jax.random.uniform(next(it), shape, jnp.float32, -lim, lim)

    w_in = nrm((in_channels, hidden_dim), (2.0 / (in_channels + hidden_dim)) ** 0.5)
    b_in = unif((1, hidden_dim), 1.0 / (in_channels ** 0.5))
    w_out = nrm((hidden_dim, out_channels), (2.0 / (hidden_dim + out_channels)) ** 0.5)
    b_out = unif((1, out_channels), 1.0 / (hidden_dim ** 0.5))

    # TODO(synk): fixed dense stand-in for torch_harmonics RealSHT / inverse (same S both ways).
    S = nrm((P, K), 1.0 / (P ** 0.5))
    shtT_head = jnp.transpose(S[:, :modes])   # [modes, P]  forward transform (active modes)
    isht_head = S[:, :modes]                  # [P, modes]
    isht_tail = S[:, modes:]                  # [P, K - modes]
    # Forward-transform image of the input-proj bias (linearity of the stand-in SHT),
    # folded at init so stage 1 needs a single fused matmul chain.
    b_in_coeff = jnp.sum(isht_head, axis=0)[:, None] * b_in   # [modes, H]

    xav = (1.0 / (hidden_dim * modes)) ** 0.5   # xavier_normal_ on [H, H, modes]
    wr, wi, bias, lw, lb = [], [], [], [], []
    for _ in range(num_layers):
        wr.append(nrm((modes, hidden_dim, hidden_dim), xav))
        # weights_imag exists in the reference module but cannot reach the (real) Linear
        # output under the interpretation used here; kept as a parameter, unused in compute.
        wi.append(nrm((modes, hidden_dim, hidden_dim), xav))
        bias.append(jnp.zeros((K, hidden_dim), jnp.float32))   # reference: zeros ([H, K] transposed)
        lw.append(nrm((hidden_dim, hidden_dim), (1.0 / hidden_dim) ** 0.5))
        lb.append(unif((1, hidden_dim), 1.0 / (hidden_dim ** 0.5)))

    return {
        'w_in': w_in, 'b_in': b_in, 'b_in_coeff': b_in_coeff,
        'w_out': w_out, 'b_out': b_out,
        'shtT_head': shtT_head, 'isht_head': isht_head, 'isht_tail': isht_tail,
        'wr': jnp.stack(wr), 'wi': jnp.stack(wi), 'bias': jnp.stack(bias),
        'lw': jnp.stack(lw), 'lb': jnp.stack(lb),
    }


# ------------------------------------ forward pass ---------------------------------------
def spherical_fno_forward(x, params, *, lmax, nlat, nlon):
    B = x.shape[0]
    modes = lmax + 1
    P = nlat * nlon
    Cout = params['w_out'].shape[1]

    # NCHW -> [B, P, Cin]: one cheap layout change on the smallest tensor in the pipeline.
    x_bpc = jnp.transpose(x, (0, 2, 3, 1)).reshape(B, P, -1).astype(jnp.float32)

    # Stage 1: fused forward SHT + input projection (active modes only): [B, modes, H]
    head = grid_to_coeff(x_bpc, params['shtT_head'], params['w_in'], params['b_in_coeff'])

    # Stage 2: all SFNO layers in ONE pallas_call (head carried in VMEM across layers).
    head = sfno_layers(head, params['wr'], params['bias'][:, :modes],
                       params['lw'], params['lb'])

    # Tail coefficients (k >= modes) of the LAST layer: gelu(bias @ lw + lb), batch-independent.
    tail = pallas_linear(params['bias'][-1, modes:], params['lw'][-1], params['lb'][-1],
                         gelu=True)

    # Stage 3: fused output projection + inverse SHT: [B, P, Cout]
    y_bpc = coeff_to_grid(head, tail, params['isht_head'], params['isht_tail'],
                          params['w_out'], params['b_out'])

    # [B, P, Cout] -> NCHW
    return jnp.transpose(y_bpc.reshape(B, nlat, nlon, Cout), (0, 3, 1, 2))


# ------------------------------ pure-jnp reference (same math) ----------------------------
def _reference_forward(x, params, lmax, nlat, nlon):
    B = x.shape[0]
    modes = lmax + 1
    P = nlat * nlon
    Cout = params['w_out'].shape[1]
    x_bpc = jnp.transpose(x, (0, 2, 3, 1)).reshape(B, P, -1).astype(jnp.float32)
    head = jnp.einsum('mp,bpc->bmc', params['shtT_head'], x_bpc)
    head = jnp.einsum('bmc,ch->bmh', head, params['w_in']) + params['b_in_coeff'][None]
    L = params['wr'].shape[0]
    for l in range(L):
        y = jnp.einsum('bmi,mio->bmo', head, params['wr'][l]) + params['bias'][l, :modes][None]
        z = jnp.einsum('bmi,io->bmo', y, params['lw'][l]) + params['lb'][l][None]
        head = jax.nn.gelu(z, approximate=True)
    tail = jax.nn.gelu(params['bias'][-1, modes:] @ params['lw'][-1] + params['lb'][-1],
                       approximate=True)
    hw = jnp.einsum('bmh,ho->bmo', head, params['w_out'])
    tw = tail @ params['w_out']
    y_bpc = (jnp.einsum('pm,bmo->bpo', params['isht_head'], hw)
             + (params['isht_tail'] @ tw)[None] + params['b_out'][None])
    return jnp.transpose(y_bpc.reshape(B, nlat, nlon, Cout), (0, 3, 1, 2))


if __name__ == "__main__":
    B, Cin, HID, Cout = 2, 4, 32, 3
    LMAX, NLAT, NLON, NLAYERS = 7, 16, 16, 2

    key = jax.random.PRNGKey(0)
    kx, kp = jax.random.split(key)
    x = jax.random.normal(kx, (B, Cin, NLAT, NLON), jnp.float32)
    params = init_params(kp, Cin, HID, Cout, LMAX, NLAT, NLON, NLAYERS)

    fwd = jax.jit(functools.partial(spherical_fno_forward, lmax=LMAX, nlat=NLAT, nlon=NLON))
    y = fwd(x, params)
    jax.block_until_ready(y)
    assert y.shape == (B, Cout, NLAT, NLON) and y.dtype == jnp.float32

    # Sanity check vs a pure-jnp reference of the same math (loose f32/MXU tolerance).
    y_ref = _reference_forward(x, params, LMAX, NLAT, NLON)
    err = float(jnp.max(jnp.abs(y - y_ref)))
    assert err < 5e-2, f"max abs error vs reference: {err}"
    print("KERNEL_OK")
</pallas_src>

<mosaic_0001>
module attributes {stable_mosaic.version = 11 : i64} {
  func.func @_grid_to_coeff_kernel(%arg0: i32, %arg1: i32, %arg2: memref<1x256x4xf32, #tpu.memory_space<vmem>>, %arg3: memref<8x256xf32, #tpu.memory_space<vmem>>, %arg4: memref<4x32xf32, #tpu.memory_space<vmem>>, %arg5: memref<8x32xf32, #tpu.memory_space<vmem>>, %arg6: memref<1x8x32xf32, #tpu.memory_space<vmem>>, %arg7: memref<8x4xf32, #tpu.memory_space<vmem>>) attributes {dimension_semantics = [#tpu.dimension_semantics<parallel>, #tpu.dimension_semantics<arbitrary>], iteration_bounds = array<i64: 2, 1>, scalar_prefetch = 0 : i64, scratch_operands = 1 : i64, tpu.core_type = #tpu.core_type<tc>, window_params = [{transform_indices = @transform_0, window_bounds = array<i64: 1, 256, 4>}, {transform_indices = @transform_1, window_bounds = array<i64: 8, 256>}, {pipeline_mode = #tpu.pipeline_mode<synchronous>, transform_indices = @transform_2, window_bounds = array<i64: 4, 32>}, {pipeline_mode = #tpu.pipeline_mode<synchronous>, transform_indices = @transform_3, window_bounds = array<i64: 8, 32>}, {transform_indices = @transform_4, window_bounds = array<i64: 1, 8, 32>}]} {
    %c0_i32 = arith.constant 0 : i32
    %0 = arith.cmpi eq, %arg1, %c0_i32 : i32
    %1 = arith.extui %0 : i1 to i32
    %c0_i32_0 = arith.constant 0 : i32
    %2 = arith.cmpi ne, %1, %c0_i32_0 : i32
    scf.if %2 {
      %cst_11 = arith.constant 0.000000e+00 : f32
      %13 = vector.broadcast %cst_11 : f32 to vector<8x4xf32>
      %c0_12 = arith.constant 0 : index
      %c0_13 = arith.constant 0 : index
      %14 = vector.load %arg7[%c0_12, %c0_13] : memref<8x4xf32, #tpu.memory_space<vmem>>, vector<8x4xf32>
      tpu.vector_store %arg7[%c0_12, %c0_13], %13 {strides = array<i32>} : memref<8x4xf32, #tpu.memory_space<vmem>>, vector<8x4xf32>,
    } else {
    }
    %c0 = arith.constant 0 : index
    %c0_1 = arith.constant 0 : index
    %3 = vector.load %arg7[%c0, %c0_1] : memref<8x4xf32, #tpu.memory_space<vmem>>, vector<8x4xf32>
    %c0_2 = arith.constant 0 : index
    %c0_3 = arith.constant 0 : index
    %4 = vector.load %arg3[%c0_2, %c0_3] : memref<8x256xf32, #tpu.memory_space<vmem>>, vector<8x256xf32>
    %c0_4 = arith.constant 0 : index
    %c0_5 = arith.constant 0 : index
    %c0_6 = arith.constant 0 : index
    %5 = vector.load %arg2[%c0_4, %c0_5, %c0_6] : memref<1x256x4xf32, #tpu.memory_space<vmem>>, vector<1x256x4xf32>
    %6 = vector.shape_cast %5 : vector<1x256x4xf32> to vector<256x4xf32>
    %cst = arith.constant dense<0.000000e+00> : vector<8x4xf32>
    %7 = tpu.matmul %4, %6, %cst {dimension_numbers = #tpu.dot_dimension_numbers<[1], [0], [0], [1], [0, 0, 1, 1], [], []>} : vector<8x256xf32>, vector<256x4xf32>, vector<8x4xf32> -> vector<8x4xf32>
    %8 = arith.addf %3, %7 : vector<8x4xf32>
    %c0_7 = arith.constant 0 : index
    %c0_8 = arith.constant 0 : index
    %9 = vector.load %arg7[%c0_7, %c0_8] : memref<8x4xf32, #tpu.memory_space<vmem>>, vector<8x4xf32>
    tpu.vector_store %arg7[%c0_7, %c0_8], %8 {strides = array<i32>} : memref<8x4xf32, #tpu.memory_space<vmem>>, vector<8x4xf32>,
    %c0_i32_9 = arith.constant 0 : i32
    %10 = arith.cmpi eq, %arg1, %c0_i32_9 : i32
    %11 = arith.extui %10 : i1 to i32
    %c0_i32_10 = arith.constant 0 : i32
    %12 = arith.cmpi ne, %11, %c0_i32_10 : i32
    scf.if %12 {
      %c0_11 = arith.constant 0 : index
      %c0_12 = arith.constant 0 : index
      %13 = vector.load %arg7[%c0_11, %c0_12] : memref<8x4xf32, #tpu.memory_space<vmem>>, vector<8x4xf32>
      %c0_13 = arith.constant 0 : index
      %c0_14 = arith.constant 0 : index
      %14 = vector.load %arg4[%c0_13, %c0_14] : memref<4x32xf32, #tpu.memory_space<vmem>>, vector<4x32xf32>
      %cst_15 = arith.constant dense<0.000000e+00> : vector<8x32xf32>
      %15 = tpu.matmul %13, %14, %cst_15 {dimension_numbers = #tpu.dot_dimension_numbers<[1], [0], [0], [1], [0, 0, 1, 1], [], []>} : vector<8x4xf32>, vector<4x32xf32>, vector<8x32xf32> -> vector<8x32xf32>
      %c0_16 = arith.constant 0 : index
      %c0_17 = arith.constant 0 : index
      %16 = vector.load %arg5[%c0_16, %c0_17] : memref<8x32xf32, #tpu.memory_space<vmem>>, vector<8x32xf32>
      %17 = arith.addf %15, %16 : vector<8x32xf32>
      %c0_18 = arith.constant 0 : index
      %c0_19 = arith.constant 0 : index
      %c0_20 = arith.constant 0 : index
      %18 = vector.load %arg6[%c0_18, %c0_19, %c0_20] : memref<1x8x32xf32, #tpu.memory_space<vmem>>, vector<1x8x32xf32>
      %19 = vector.shape_cast %18 : vector<1x8x32xf32> to vector<8x32xf32>
      %20 = vector.shape_cast %17 : vector<8x32xf32> to vector<1x8x32xf32>
      tpu.vector_store %arg6[%c0_18, %c0_19, %c0_20], %20 {strides = array<i32>} : memref<1x8x32xf32, #tpu.memory_space<vmem>>, vector<1x8x32xf32>,
    } else {
    }
    return
  }
  func.func @transform_0(%arg0: i32, %arg1: i32) -> (i32, i32, i32) {
    %c0_i32 = arith.constant 0 : i32
    %c0_i32_0 = arith.constant 0 : i32
    return %arg0, %arg1, %c0_i32 : i32, i32, i32
  }
  func.func @transform_1(%arg0: i32, %arg1: i32) -> (i32, i32) {
    %c0_i32 = arith.constant 0 : i32
    %c0_i32_0 = arith.constant 0 : i32
    return %c0_i32, %arg1 : i32, i32
  }
  func.func @transform_2(%arg0: i32, %arg1: i32) -> (i32, i32) {
    %c0_i32 = arith.constant 0 : i32
    %c0_i32_0 = arith.constant 0 : i32
    %c0_i32_1 = arith.constant 0 : i32
    return %c0_i32, %c0_i32_0 : i32, i32
  }
  func.func @transform_3(%arg0: i32, %arg1: i32) -> (i32, i32) {
    %c0_i32 = arith.constant 0 : i32
    %c0_i32_0 = arith.constant 0 : i32
    %c0_i32_1 = arith.constant 0 : i32
    return %c0_i32, %c0_i32_0 : i32, i32
  }
  func.func @transform_4(%arg0: i32, %arg1: i32) -> (i32, i32, i32) {
    %c0_i32 = arith.constant 0 : i32
    %c0_i32_0 = arith.constant 0 : i32
    %c0_i32_1 = arith.constant 0 : i32
    return %arg0, %c0_i32, %c0_i32_0 : i32, i32, i32
  }
}

module attributes {stable_mosaic.version = 11 : i64} {
  func.func @_sfno_layers_kernel(%arg0: i32, %arg1: i32, %arg2: memref<1x8x32xf32, #tpu.memory_space<vmem>>, %arg3: memref<1x8x32x32xf32, #tpu.memory_space<vmem>>, %arg4: memref<1x8x32xf32, #tpu.memory_space<vmem>>, %arg5: memref<1x32x32xf32, #tpu.memory_space<vmem>>, %arg6: memref<1x1x32xf32, #tpu.memory_space<vmem>>, %arg7: memref<1x8x32xf32, #tpu.memory_space<vmem>>) attributes {dimension_semantics = [#tpu.dimension_semantics<parallel>, #tpu.dimension_semantics<arbitrary>], iteration_bounds = array<i64: 2, 2>, scalar_prefetch = 0 : i64, scratch_operands = 0 : i64, tpu.core_type = #tpu.core_type<tc>, window_params = [{transform_indices = @transform_0, window_bounds = array<i64: 1, 8, 32>}, {transform_indices = @transform_1, window_bounds = array<i64: 1, 8, 32, 32>}, {transform_indices = @transform_2, window_bounds = array<i64: 1, 8, 32>}, {transform_indices = @transform_3, window_bounds = array<i64: 1, 32, 32>}, {transform_indices = @transform_4, window_bounds = array<i64: 1, 1, 32>}, {transform_indices = @transform_5, window_bounds = array<i64: 1, 8, 32>}]} {
    %c0_i32 = arith.constant 0 : i32
    %0 = arith.cmpi eq, %arg1, %c0_i32 : i32
    %1 = arith.extui %0 : i1 to i32
    %c0_i32_0 = arith.constant 0 : i32
    %2 = arith.cmpi ne, %1, %c0_i32_0 : i32
    scf.if %2 {
      %c0_150 = arith.constant 0 : index
      %c0_151 = arith.constant 0 : index
      %c0_152 = arith.constant 0 : index
      %215 = vector.load %arg2[%c0_150, %c0_151, %c0_152] : memref<1x8x32xf32, #tpu.memory_space<vmem>>, vector<1x8x32xf32>
      %216 = vector.shape_cast %215 : vector<1x8x32xf32> to vector<8x32xf32>
      %c0_153 = arith.constant 0 : index
      %c0_154 = arith.constant 0 : index
      %c0_155 = arith.constant 0 : index
      %217 = vector.load %arg7[%c0_153, %c0_154, %c0_155] : memref<1x8x32xf32, #tpu.memory_space<vmem>>, vector<1x8x32xf32>
      %218 = vector.shape_cast %217 : vector<1x8x32xf32> to vector<8x32xf32>
      %219 = vector.shape_cast %216 : vector<8x32xf32> to vector<1x8x32xf32>
      tpu.vector_store %arg7[%c0_153, %c0_154, %c0_155], %219 {strides = array<i32>} : memref<1x8x32xf32, #tpu.memory_space<vmem>>, vector<1x8x32xf32>,
    } else {
    }
    %c0 = arith.constant 0 : index
    %c0_1 = arith.constant 0 : index
    %c0_2 = arith.constant 0 : index
    %3 = vector.load %arg5[%c0, %c0_1, %c0_2] : memref<1x32x32xf32, #tpu.memory_space<vmem>>, vector<1x32x32xf32>
    %4 = vector.shape_cast %3 : vector<1x32x32xf32> to vector<32x32xf32>
    %c0_3 = arith.constant 0 : index
    %c0_4 = arith.constant 0 : index
    %c0_5 = arith.constant 0 : index
    %5 = vector.load %arg6[%c0_3, %c0_4, %c0_5] : memref<1x1x32xf32, #tpu.memory_space<vmem>>, vector<1x1x32xf32>
    %6 = vector.shape_cast %5 : vector<1x1x32xf32> to vector<1x32xf32>
    %c0_6 = arith.constant 0 : index
    %c0_7 = arith.constant 0 : index
    %c0_8 = arith.constant 0 : index
    %7 = vector.load %arg7[%c0_6, %c0_7, %c0_8] : memref<1x8x32xf32, #tpu.memory_space<vmem>>, vector<1x1x32xf32>
    %8 = vector.shape_cast %7 : vector<1x1x32xf32> to vector<1x32xf32>
    %c0_9 = arith.constant 0 : index
    %c0_10 = arith.constant 0 : index
    %c0_11 = arith.constant 0 : index
    %c0_12 = arith.constant 0 : index
    %9 = vector.load %arg3[%c0_9, %c0_10, %c0_11, %c0_12] : memref<1x8x32x32xf32, #tpu.memory_space<vmem>>, vector<1x1x32x32xf32>
    %10 = vector.shape_cast %9 : vector<1x1x32x32xf32> to vector<32x32xf32>
    %cst = arith.constant dense<0.000000e+00> : vector<1x32xf32>
    %11 = tpu.matmul %8, %10, %cst {dimension_numbers = #tpu.dot_dimension_numbers<[1], [0], [0], [1], [0, 0, 1, 1], [], []>} : vector<1x32xf32>, vector<32x32xf32>, vector<1x32xf32> -> vector<1x32xf32>
    %c0_13 = arith.constant 0 : index
    %c0_14 = arith.constant 0 : index
    %c0_15 = arith.constant 0 : index
    %12 = vector.load %arg4[%c0_13, %c0_14, %c0_15] : memref<1x8x32xf32, #tpu.memory_space<vmem>>, vector<1x1x32xf32>
    %13 = vector.shape_cast %12 : vector<1x1x32xf32> to vector<1x32xf32>
    %14 = arith.addf %11, %13 : vector<1x32xf32>
    %cst_16 = arith.constant dense<0.000000e+00> : vector<1x32xf32>
    %15 = tpu.matmul %14, %4, %cst_16 {dimension_numbers = #tpu.dot_dimension_numbers<[1], [0], [0], [1], [0, 0, 1, 1], [], []>} : vector<1x32xf32>, vector<32x32xf32>, vector<1x32xf32> -> vector<1x32xf32>
    %16 = arith.addf %15, %6 : vector<1x32xf32>
    %17 = arith.mulf %16, %16 : vector<1x32xf32>
    %18 = arith.mulf %16, %17 : vector<1x32xf32>
    %cst_17 = arith.constant 4.471500e-02 : f32
    %19 = vector.broadcast %cst_17 : f32 to vector<1x32xf32>
    %20 = arith.mulf %19, %18 : vector<1x32xf32>
    %21 = arith.addf %16, %20 : vector<1x32xf32>
    %cst_18 = arith.constant 0.797884583 : f32
    %22 = vector.broadcast %cst_18 : f32 to vector<1x32xf32>
    %23 = arith.mulf %22, %21 : vector<1x32xf32>
    %24 = math.tanh %23 : vector<1x32xf32>
    %cst_19 = arith.constant 1.000000e+00 : f32
    %25 = vector.broadcast %cst_19 : f32 to vector<1x32xf32>
    %26 = arith.addf %25, %24 : vector<1x32xf32>
    %cst_20 = arith.constant 5.000000e-01 : f32
    %27 = vector.broadcast %cst_20 : f32 to vector<1x32xf32>
    %28 = arith.mulf %27, %26 : vector<1x32xf32>
    %29 = arith.mulf %16, %28 : vector<1x32xf32>
    %c0_21 = arith.constant 0 : index
    %c0_22 = arith.constant 0 : index
    %c0_23 = arith.constant 0 : index
    %30 = vector.load %arg7[%c0_21, %c0_22, %c0_23] : memref<1x8x32xf32, #tpu.memory_space<vmem>>, vector<1x1x32xf32>
    %31 = vector.shape_cast %30 : vector<1x1x32xf32> to vector<1x32xf32>
    %32 = vector.shape_cast %29 : vector<1x32xf32> to vector<1x1x32xf32>
    tpu.vector_store %arg7[%c0_21, %c0_22, %c0_23], %32 {strides = array<i32>} : memref<1x8x32xf32, #tpu.memory_space<vmem>>, vector<1x1x32xf32>,
    %c0_24 = arith.constant 0 : index
    %c1 = arith.constant 1 : index
    %c0_25 = arith.constant 0 : index
    %33 = vector.load %arg7[%c0_24, %c1, %c0_25] : memref<1x8x32xf32, #tpu.memory_space<vmem>>, vector<1x1x32xf32>
    %34 = vector.shape_cast %33 : vector<1x1x32xf32> to vector<1x32xf32>
    %c0_26 = arith.constant 0 : index
    %c1_27 = arith.constant 1 : index
    %c0_28 = arith.constant 0 : index
    %c0_29 = arith.constant 0 : index
    %35 = vector.load %arg3[%c0_26, %c1_27, %c0_28, %c0_29] : memref<1x8x32x32xf32, #tpu.memory_space<vmem>>, vector<1x1x32x32xf32>
    %36 = vector.shape_cast %35 : vector<1x1x32x32xf32> to vector<32x32xf32>
    %cst_30 = arith.constant dense<0.000000e+00> : vector<1x32xf32>
    %37 = tpu.matmul %34, %36, %cst_30 {dimension_numbers = #tpu.dot_dimension_numbers<[1], [0], [0], [1], [0, 0, 1, 1], [], []>} : vector<1x32xf32>, vector<32x32xf32>, vector<1x32xf32> -> vector<1x32xf32>
    %c0_31 = arith.constant 0 : index
    %c1_32 = arith.constant 1 : index
    %c0_33 = arith.constant 0 : index
    %38 = vector.load %arg4[%c0_31, %c1_32, %c0_33] : memref<1x8x32xf32, #tpu.memory_space<vmem>>, vector<1x1x32xf32>
    %39 = vector.shape_cast %38 : vector<1x1x32xf32> to vector<1x32xf32>
    %40 = arith.addf %37, %39 : vector<1x32xf32>
    %cst_34 = arith.constant dense<0.000000e+00> : vector<1x32xf32>
    %41 = tpu.matmul %40, %4, %cst_34 {dimension_numbers = #tpu.dot_dimension_numbers<[1], [0], [0], [1], [0, 0, 1, 1], [], []>} : vector<1x32xf32>, vector<32x32xf32>, vector<1x32xf32> -> vector<1x32xf32>
    %42 = arith.addf %41, %6 : vector<1x32xf32>
    %43 = arith.mulf %42, %42 : vector<1x32xf32>
    %44 = arith.mulf %42, %43 : vector<1x32xf32>
    %cst_35 = arith.constant 4.471500e-02 : f32
    %45 = vector.broadcast %cst_35 : f32 to vector<1x32xf32>
    %46 = arith.mulf %45, %44 : vector<1x32xf32>
    %47 = arith.addf %42, %46 : vector<1x32xf32>
    %cst_36 = arith.constant 0.797884583 : f32
    %48 = vector.broadcast %cst_36 : f32 to vector<1x32xf32>
    %49 = arith.mulf %48, %47 : vector<1x32xf32>
    %50 = math.tanh %49 : vector<1x32xf32>
    %cst_37 = arith.constant 1.000000e+00 : f32
    %51 = vector.broadcast %cst_37 : f32 to vector<1x32xf32>
    %52 = arith.addf %51, %50 : vector<1x32xf32>
    %cst_38 = arith.constant 5.000000e-01 : f32
    %53 = vector.broadcast %cst_38 : f32 to vector<1x32xf32>
    %54 = arith.mulf %53, %52 : vector<1x32xf32>
    %55 = arith.mulf %42, %54 : vector<1x32xf32>
    %c0_39 = arith.constant 0 : index
    %c1_40 = arith.constant 1 : index
    %c0_41 = arith.constant 0 : index
    %56 = vector.load %arg7[%c0_39, %c1_40, %c0_41] : memref<1x8x32xf32, #tpu.memory_space<vmem>>, vector<1x1x32xf32>
    %57 = vector.shape_cast %56 : vector<1x1x32xf32> to vector<1x32xf32>
    %58 = vector.shape_cast %55 : vector<1x32xf32> to vector<1x1x32xf32>
    tpu.vector_store %arg7[%c0_39, %c1_40, %c0_41], %58 {strides = array<i32>} : memref<1x8x32xf32, #tpu.memory_space<vmem>>, vector<1x1x32xf32>,
    %c0_42 = arith.constant 0 : index
    %c2 = arith.constant 2 : index
    %c0_43 = arith.constant 0 : index
    %59 = vector.load %arg7[%c0_42, %c2, %c0_43] : memref<1x8x32xf32, #tpu.memory_space<vmem>>, vector<1x1x32xf32>
    %60 = vector.shape_cast %59 : vector<1x1x32xf32> to vector<1x32xf32>
    %c0_44 = arith.constant 0 : index
    %c2_45 = arith.constant 2 : index
    %c0_46 = arith.constant 0 : index
    %c0_47 = arith.constant 0 : index
    %61 = vector.load %arg3[%c0_44, %c2_45, %c0_46, %c0_47] : memref<1x8x32x32xf32, #tpu.memory_space<vmem>>, vector<1x1x32x32xf32>
    %62 = vector.shape_cast %61 : vector<1x1x32x32xf32> to vector<32x32xf32>
    %cst_48 = arith.constant dense<0.000000e+00> : vector<1x32xf32>
    %63 = tpu.matmul %60, %62, %cst_48 {dimension_numbers = #tpu.dot_dimension_numbers<[1], [0], [0], [1], [0, 0, 1, 1], [], []>} : vector<1x32xf32>, vector<32x32xf32>, vector<1x32xf32> -> vector<1x32xf32>
    %c0_49 = arith.constant 0 : index
    %c2_50 = arith.constant 2 : index
    %c0_51 = arith.constant 0 : index
    %64 = vector.load %arg4[%c0_49, %c2_50, %c0_51] : memref<1x8x32xf32, #tpu.memory_space<vmem>>, vector<1x1x32xf32>
    %65 = vector.shape_cast %64 : vector<1x1x32xf32> to vector<1x32xf32>
    %66 = arith.addf %63, %65 : vector<1x32xf32>
    %cst_52 = arith.constant dense<0.000000e+00> : vector<1x32xf32>
    %67 = tpu.matmul %66, %4, %cst_52 {dimension_numbers = #tpu.dot_dimension_numbers<[1], [0], [0], [1], [0, 0, 1, 1], [], []>} : vector<1x32xf32>, vector<32x32xf32>, vector<1x32xf32> -> vector<1x32xf32>
    %68 = arith.addf %67, %6 : vector<1x32xf32>
    %69 = arith.mulf %68, %68 : vector<1x32xf32>
    %70 = arith.mulf %68, %69 : vector<1x32xf32>
    %cst_53 = arith.constant 4.471500e-02 : f32
    %71 = vector.broadcast %cst_53 : f32 to vector<1x32xf32>
    %72 = arith.mulf %71, %70 : vector<1x32xf32>
    %73 = arith.addf %68, %72 : vector<1x32xf32>
    %cst_54 = arith.constant 0.797884583 : f32
    %74 = vector.broadcast %cst_54 : f32 to vector<1x32xf32>
    %75 = arith.mulf %74, %73 : vector<1x32xf32>
    %76 = math.tanh %75 : vector<1x32xf32>
    %cst_55 = arith.constant 1.000000e+00 : f32
    %77 = vector.broadcast %cst_55 : f32 to vector<1x32xf32>
    %78 = arith.addf %77, %76 : vector<1x32xf32>
    %cst_56 = arith.constant 5.000000e-01 : f32
    %79 = vector.broadcast %cst_56 : f32 to vector<1x32xf32>
    %80 = arith.mulf %79, %78 : vector<1x32xf32>
    %81 = arith.mulf %68, %80 : vector<1x32xf32>
    %c0_57 = arith.constant 0 : index
    %c2_58 = arith.constant 2 : index
    %c0_59 = arith.constant 0 : index
    %82 = vector.load %arg7[%c0_57, %c2_58, %c0_59] : memref<1x8x32xf32, #tpu.memory_space<vmem>>, vector<1x1x32xf32>
    %83 = vector.shape_cast %82 : vector<1x1x32xf32> to vector<1x32xf32>
    %84 = vector.shape_cast %81 : vector<1x32xf32> to vector<1x1x32xf32>
    tpu.vector_store %arg7[%c0_57, %c2_58, %c0_59], %84 {strides = array<i32>} : memref<1x8x32xf32, #tpu.memory_space<vmem>>, vector<1x1x32xf32>,
    %c0_60 = arith.constant 0 : index
    %c3 = arith.constant 3 : index
    %c0_61 = arith.constant 0 : index
    %85 = vector.load %arg7[%c0_60, %c3, %c0_61] : memref<1x8x32xf32, #tpu.memory_space<vmem>>, vector<1x1x32xf32>
    %86 = vector.shape_cast %85 : vector<1x1x32xf32> to vector<1x32xf32>
    %c0_62 = arith.constant 0 : index
    %c3_63 = arith.constant 3 : index
    %c0_64 = arith.constant 0 : index
    %c0_65 = arith.constant 0 : index
    %87 = vector.load %arg3[%c0_62, %c3_63, %c0_64, %c0_65] : memref<1x8x32x32xf32, #tpu.memory_space<vmem>>, vector<1x1x32x32xf32>
    %88 = vector.shape_cast %87 : vector<1x1x32x32xf32> to vector<32x32xf32>
    %cst_66 = arith.constant dense<0.000000e+00> : vector<1x32xf32>
    %89 = tpu.matmul %86, %88, %cst_66 {dimension_numbers = #tpu.dot_dimension_numbers<[1], [0], [0], [1], [0, 0, 1, 1], [], []>} : vector<1x32xf32>, vector<32x32xf32>, vector<1x32xf32> -> vector<1x32xf32>
    %c0_67 = arith.constant 0 : index
    %c3_68 = arith.constant 3 : index
    %c0_69 = arith.constant 0 : index
    %90 = vector.load %arg4[%c0_67, %c3_68, %c0_69] : memref<1x8x32xf32, #tpu.memory_space<vmem>>, vector<1x1x32xf32>
    %91 = vector.shape_cast %90 : vector<1x1x32xf32> to vector<1x32xf32>
    %92 = arith.addf %89, %91 : vector<1x32xf32>
    %cst_70 = arith.constant dense<0.000000e+00> : vector<1x32xf32>
    %93 = tpu.matmul %92, %4, %cst_70 {dimension_numbers = #tpu.dot_dimension_numbers<[1], [0], [0], [1], [0, 0, 1, 1], [], []>} : vector<1x32xf32>, vector<32x32xf32>, vector<1x32xf32> -> vector<1x32xf32>
    %94 = arith.addf %93, %6 : vector<1x32xf32>
    %95 = arith.mulf %94, %94 : vector<1x32xf32>
    %96 = arith.mulf %94, %95 : vector<1x32xf32>
    %cst_71 = arith.constant 4.471500e-02 : f32
    %97 = vector.broadcast %cst_71 : f32 to vector<1x32xf32>
    %98 = arith.mulf %97, %96 : vector<1x32xf32>
    %99 = arith.addf %94, %98 : vector<1x32xf32>
    %cst_72 = arith.constant 0.797884583 : f32
    %100 = vector.broadcast %cst_72 : f32 to vector<1x32xf32>
    %101 = arith.mulf %100, %99 : vector<1x32xf32>
    %102 = math.tanh %101 : vector<1x32xf32>
    %cst_73 = arith.constant 1.000000e+00 : f32
    %103 = vector.broadcast %cst_73 : f32 to vector<1x32xf32>
    %104 = arith.addf %103, %102 : vector<1x32xf32>
    %cst_74 = arith.constant 5.000000e-01 : f32
    %105 = vector.broadcast %cst_74 : f32 to vector<1x32xf32>
    %106 = arith.mulf %105, %104 : vector<1x32xf32>
    %107 = arith.mulf %94, %106 : vector<1x32xf32>
    %c0_75 = arith.constant 0 : index
    %c3_76 = arith.constant 3 : index
    %c0_77 = arith.constant 0 : index
    %108 = vector.load %arg7[%c0_75, %c3_76, %c0_77] : memref<1x8x32xf32, #tpu.memory_space<vmem>>, vector<1x1x32xf32>
    %109 = vector.shape_cast %108 : vector<1x1x32xf32> to vector<1x32xf32>
    %110 = vector.shape_cast %107 : vector<1x32xf32> to vector<1x1x32xf32>
    tpu.vector_store %arg7[%c0_75, %c3_76, %c0_77], %110 {strides = array<i32>} : memref<1x8x32xf32, #tpu.memory_space<vmem>>, vector<1x1x32xf32>,
    %c0_78 = arith.constant 0 : index
    %c4 = arith.constant 4 : index
    %c0_79 = arith.constant 0 : index
    %111 = vector.load %arg7[%c0_78, %c4, %c0_79] : memref<1x8x32xf32, #tpu.memory_space<vmem>>, vector<1x1x32xf32>
    %112 = vector.shape_cast %111 : vector<1x1x32xf32> to vector<1x32xf32>
    %c0_80 = arith.constant 0 : index
    %c4_81 = arith.constant 4 : index
    %c0_82 = arith.constant 0 : index
    %c0_83 = arith.constant 0 : index
    %113 = vector.load %arg3[%c0_80, %c4_81, %c0_82, %c0_83] : memref<1x8x32x32xf32, #tpu.memory_space<vmem>>, vector<1x1x32x32xf32>
    %114 = vector.shape_cast %113 : vector<1x1x32x32xf32> to vector<32x32xf32>
    %cst_84 = arith.constant dense<0.000000e+00> : vector<1x32xf32>
    %115 = tpu.matmul %112, %114, %cst_84 {dimension_numbers = #tpu.dot_dimension_numbers<[1], [0], [0], [1], [0, 0, 1, 1], [], []>} : vector<1x32xf32>, vector<32x32xf32>, vector<1x32xf32> -> vector<1x32xf32>
    %c0_85 = arith.constant 0 : index
    %c4_86 = arith.constant 4 : index
    %c0_87 = arith.constant 0 : index
    %116 = vector.load %arg4[%c0_85, %c4_86, %c0_87] : memref<1x8x32xf32, #tpu.memory_space<vmem>>, vector<1x1x32xf32>
    %117 = vector.shape_cast %116 : vector<1x1x32xf32> to vector<1x32xf32>
    %118 = arith.addf %115, %117 : vector<1x32xf32>
    %cst_88 = arith.constant dense<0.000000e+00> : vector<1x32xf32>
    %119 = tpu.matmul %118, %4, %cst_88 {dimension_numbers = #tpu.dot_dimension_numbers<[1], [0], [0], [1], [0, 0, 1, 1], [], []>} : vector<1x32xf32>, vector<32x32xf32>, vector<1x32xf32> -> vector<1x32xf32>
    %120 = arith.addf %119, %6 : vector<1x32xf32>
    %121 = arith.mulf %120, %120 : vector<1x32xf32>
    %122 = arith.mulf %120, %121 : vector<1x32xf32>
    %cst_89 = arith.constant 4.471500e-02 : f32
    %123 = vector.broadcast %cst_89 : f32 to vector<1x32xf32>
    %124 = arith.mulf %123, %122 : vector<1x32xf32>
    %125 = arith.addf %120, %124 : vector<1x32xf32>
    %cst_90 = arith.constant 0.797884583 : f32
    %126 = vector.broadcast %cst_90 : f32 to vector<1x32xf32>
    %127 = arith.mulf %126, %125 : vector<1x32xf32>
    %128 = math.tanh %127 : vector<1x32xf32>
    %cst_91 = arith.constant 1.000000e+00 : f32
    %129 = vector.broadcast %cst_91 : f32 to vector<1x32xf32>
    %130 = arith.addf %129, %128 : vector<1x32xf32>
    %cst_92 = arith.constant 5.000000e-01 : f32
    %131 = vector.broadcast %cst_92 : f32 to vector<1x32xf32>
    %132 = arith.mulf %131, %130 : vector<1x32xf32>
    %133 = arith.mulf %120, %132 : vector<1x32xf32>
    %c0_93 = arith.constant 0 : index
    %c4_94 = arith.constant 4 : index
    %c0_95 = arith.constant 0 : index
    %134 = vector.load %arg7[%c0_93, %c4_94, %c0_95] : memref<1x8x32xf32, #tpu.memory_space<vmem>>, vector<1x1x32xf32>
    %135 = vector.shape_cast %134 : vector<1x1x32xf32> to vector<1x32xf32>
    %136 = vector.shape_cast %133 : vector<1x32xf32> to vector<1x1x32xf32>
    tpu.vector_store %arg7[%c0_93, %c4_94, %c0_95], %136 {strides = array<i32>} : memref<1x8x32xf32, #tpu.memory_space<vmem>>, vector<1x1x32xf32>,
    %c0_96 = arith.constant 0 : index
    %c5 = arith.constant 5 : index
    %c0_97 = arith.constant 0 : index
    %137 = vector.load %arg7[%c0_96, %c5, %c0_97] : memref<1x8x32xf32, #tpu.memory_space<vmem>>, vector<1x1x32xf32>
    %138 = vector.shape_cast %137 : vector<1x1x32xf32> to vector<1x32xf32>
    %c0_98 = arith.constant 0 : index
    %c5_99 = arith.constant 5 : index
    %c0_100 = arith.constant 0 : index
    %c0_101 = arith.constant 0 : index
    %139 = vector.load %arg3[%c0_98, %c5_99, %c0_100, %c0_101] : memref<1x8x32x32xf32, #tpu.memory_space<vmem>>, vector<1x1x32x32xf32>
    %140 = vector.shape_cast %139 : vector<1x1x32x32xf32> to vector<32x32xf32>
    %cst_102 = arith.constant dense<0.000000e+00> : vector<1x32xf32>
    %141 = tpu.matmul %138, %140, %cst_102 {dimension_numbers = #tpu.dot_dimension_numbers<[1], [0], [0], [1], [0, 0, 1, 1], [], []>} : vector<1x32xf32>, vector<32x32xf32>, vector<1x32xf32> -> vector<1x32xf32>
    %c0_103 = arith.constant 0 : index
    %c5_104 = arith.constant 5 : index
    %c0_105 = arith.constant 0 : index
    %142 = vector.load %arg4[%c0_103, %c5_104, %c0_105] : memref<1x8x32xf32, #tpu.memory_space<vmem>>, vector<1x1x32xf32>
    %143 = vector.shape_cast %142 : vector<1x1x32xf32> to vector<1x32xf32>
    %144 = arith.addf %141, %143 : vector<1x32xf32>
    %cst_106 = arith.constant dense<0.000000e+00> : vector<1x32xf32>
    %145 = tpu.matmul %144, %4, %cst_106 {dimension_numbers = #tpu.dot_dimension_numbers<[1], [0], [0], [1], [0, 0, 1, 1], [], []>} : vector<1x32xf32>, vector<32x32xf32>, vector<1x32xf32> -> vector<1x32xf32>
    %146 = arith.addf %145, %6 : vector<1x32xf32>
    %147 = arith.mulf %146, %146 : vector<1x32xf32>
    %148 = arith.mulf %146, %147 : vector<1x32xf32>
    %cst_107 = arith.constant 4.471500e-02 : f32
    %149 = vector.broadcast %cst_107 : f32 to vector<1x32xf32>
    %150 = arith.mulf %149, %148 : vector<1x32xf32>
    %151 = arith.addf %146, %150 : vector<1x32xf32>
    %cst_108 = arith.constant 0.797884583 : f32
    %152 = vector.broadcast %cst_108 : f32 to vector<1x32xf32>
    %153 = arith.mulf %152, %151 : vector<1x32xf32>
    %154 = math.tanh %153 : vector<1x32xf32>
    %cst_109 = arith.constant 1.000000e+00 : f32
    %155 = vector.broadcast %cst_109 : f32 to vector<1x32xf32>
    %156 = arith.addf %155, %154 : vector<1x32xf32>
    %cst_110 = arith.constant 5.000000e-01 : f32
    %157 = vector.broadcast %cst_110 : f32 to vector<1x32xf32>
    %158 = arith.mulf %157, %156 : vector<1x32xf32>
    %159 = arith.mulf %146, %158 : vector<1x32xf32>
    %c0_111 = arith.constant 0 : index
    %c5_112 = arith.constant 5 : index
    %c0_113 = arith.constant 0 : index
    %160 = vector.load %arg7[%c0_111, %c5_112, %c0_113] : memref<1x8x32xf32, #tpu.memory_space<vmem>>, vector<1x1x32xf32>
    %161 = vector.shape_cast %160 : vector<1x1x32xf32> to vector<1x32xf32>
    %162 = vector.shape_cast %159 : vector<1x32xf32> to vector<1x1x32xf32>
    tpu.vector_store %arg7[%c0_111, %c5_112, %c0_113], %162 {strides = array<i32>} : memref<1x8x32xf32, #tpu.memory_space<vmem>>, vector<1x1x32xf32>,
    %c0_114 = arith.constant 0 : index
    %c6 = arith.constant 6 : index
    %c0_115 = arith.constant 0 : index
    %163 = vector.load %arg7[%c0_114, %c6, %c0_115] : memref<1x8x32xf32, #tpu.memory_space<vmem>>, vector<1x1x32xf32>
    %164 = vector.shape_cast %163 : vector<1x1x32xf32> to vector<1x32xf32>
    %c0_116 = arith.constant 0 : index
    %c6_117 = arith.constant 6 : index
    %c0_118 = arith.constant 0 : index
    %c0_119 = arith.constant 0 : index
    %165 = vector.load %arg3[%c0_116, %c6_117, %c0_118, %c0_119] : memref<1x8x32x32xf32, #tpu.memory_space<vmem>>, vector<1x1x32x32xf32>
    %166 = vector.shape_cast %165 : vector<1x1x32x32xf32> to vector<32x32xf32>
    %cst_120 = arith.constant dense<0.000000e+00> : vector<1x32xf32>
    %167 = tpu.matmul %164, %166, %cst_120 {dimension_numbers = #tpu.dot_dimension_numbers<[1], [0], [0], [1], [0, 0, 1, 1], [], []>} : vector<1x32xf32>, vector<32x32xf32>, vector<1x32xf32> -> vector<1x32xf32>
    %c0_121 = arith.constant 0 : index
    %c6_122 = arith.constant 6 : index
    %c0_123 = arith.constant 0 : index
    %168 = vector.load %arg4[%c0_121, %c6_122, %c0_123] : memref<1x8x32xf32, #tpu.memory_space<vmem>>, vector<1x1x32xf32>
    %169 = vector.shape_cast %168 : vector<1x1x32xf32> to vector<1x32xf32>
    %170 = arith.addf %167, %169 : vector<1x32xf32>
    %cst_124 = arith.constant dense<0.000000e+00> : vector<1x32xf32>
    %171 = tpu.matmul %170, %4, %cst_124 {dimension_numbers = #tpu.dot_dimension_numbers<[1], [0], [0], [1], [0, 0, 1, 1], [], []>} : vector<1x32xf32>, vector<32x32xf32>, vector<1x32xf32> -> vector<1x32xf32>
    %172 = arith.addf %171, %6 : vector<1x32xf32>
    %173 = arith.mulf %172, %172 : vector<1x32xf32>
    %174 = arith.mulf %172, %173 : vector<1x32xf32>
    %cst_125 = arith.constant 4.471500e-02 : f32
    %175 = vector.broadcast %cst_125 : f32 to vector<1x32xf32>
    %176 = arith.mulf %175, %174 : vector<1x32xf32>
    %177 = arith.addf %172, %176 : vector<1x32xf32>
    %cst_126 = arith.constant 0.797884583 : f32
    %178 = vector.broadcast %cst_126 : f32 to vector<1x32xf32>
    %179 = arith.mulf %178, %177 : vector<1x32xf32>
    %180 = math.tanh %179 : vector<1x32xf32>
    %cst_127 = arith.constant 1.000000e+00 : f32
    %181 = vector.broadcast %cst_127 : f32 to vector<1x32xf32>
    %182 = arith.addf %181, %180 : vector<1x32xf32>
    %cst_128 = arith.constant 5.000000e-01 : f32
    %183 = vector.broadcast %cst_128 : f32 to vector<1x32xf32>
    %184 = arith.mulf %183, %182 : vector<1x32xf32>
    %185 = arith.mulf %172, %184 : vector<1x32xf32>
    %c0_129 = arith.constant 0 : index
    %c6_130 = arith.constant 6 : index
    %c0_131 = arith.constant 0 : index
    %186 = vector.load %arg7[%c0_129, %c6_130, %c0_131] : memref<1x8x32xf32, #tpu.memory_space<vmem>>, vector<1x1x32xf32>
    %187 = vector.shape_cast %186 : vector<1x1x32xf32> to vector<1x32xf32>
    %188 = vector.shape_cast %185 : vector<1x32xf32> to vector<1x1x32xf32>
    tpu.vector_store %arg7[%c0_129, %c6_130, %c0_131], %188 {strides = array<i32>} : memref<1x8x32xf32, #tpu.memory_space<vmem>>, vector<1x1x32xf32>,
    %c0_132 = arith.constant 0 : index
    %c7 = arith.constant 7 : index
    %c0_133 = arith.constant 0 : index
    %189 = vector.load %arg7[%c0_132, %c7, %c0_133] : memref<1x8x32xf32, #tpu.memory_space<vmem>>, vector<1x1x32xf32>
    %190 = vector.shape_cast %189 : vector<1x1x32xf32> to vector<1x32xf32>
    %c0_134 = arith.constant 0 : index
    %c7_135 = arith.constant 7 : index
    %c0_136 = arith.constant 0 : index
    %c0_137 = arith.constant 0 : index
    %191 = vector.load %arg3[%c0_134, %c7_135, %c0_136, %c0_137] : memref<1x8x32x32xf32, #tpu.memory_space<vmem>>, vector<1x1x32x32xf32>
    %192 = vector.shape_cast %191 : vector<1x1x32x32xf32> to vector<32x32xf32>
    %cst_138 = arith.constant dense<0.000000e+00> : vector<1x32xf32>
    %193 = tpu.matmul %190, %192, %cst_138 {dimension_numbers = #tpu.dot_dimension_numbers<[1], [0], [0], [1], [0, 0, 1, 1], [], []>} : vector<1x32xf32>, vector<32x32xf32>, vector<1x32xf32> -> vector<1x32xf32>
    %c0_139 = arith.constant 0 : index
    %c7_140 = arith.constant 7 : index
    %c0_141 = arith.constant 0 : index
    %194 = vector.load %arg4[%c0_139, %c7_140, %c0_141] : memref<1x8x32xf32, #tpu.memory_space<vmem>>, vector<1x1x32xf32>
    %195 = vector.shape_cast %194 : vector<1x1x32xf32> to vector<1x32xf32>
    %196 = arith.addf %193, %195 : vector<1x32xf32>
    %cst_142 = arith.constant dense<0.000000e+00> : vector<1x32xf32>
    %197 = tpu.matmul %196, %4, %cst_142 {dimension_numbers = #tpu.dot_dimension_numbers<[1], [0], [0], [1], [0, 0, 1, 1], [], []>} : vector<1x32xf32>, vector<32x32xf32>, vector<1x32xf32> -> vector<1x32xf32>
    %198 = arith.addf %197, %6 : vector<1x32xf32>
    %199 = arith.mulf %198, %198 : vector<1x32xf32>
    %200 = arith.mulf %198, %199 : vector<1x32xf32>
    %cst_143 = arith.constant 4.471500e-02 : f32
    %201 = vector.broadcast %cst_143 : f32 to vector<1x32xf32>
    %202 = arith.mulf %201, %200 : vector<1x32xf32>
    %203 = arith.addf %198, %202 : vector<1x32xf32>
    %cst_144 = arith.constant 0.797884583 : f32
    %204 = vector.broadcast %cst_144 : f32 to vector<1x32xf32>
    %205 = arith.mulf %204, %203 : vector<1x32xf32>
    %206 = math.tanh %205 : vector<1x32xf32>
    %cst_145 = arith.constant 1.000000e+00 : f32
    %207 = vector.broadcast %cst_145 : f32 to vector<1x32xf32>
    %208 = arith.addf %207, %206 : vector<1x32xf32>
    %cst_146 = arith.constant 5.000000e-01 : f32
    %209 = vector.broadcast %cst_146 : f32 to vector<1x32xf32>
    %210 = arith.mulf %209, %208 : vector<1x32xf32>
    %211 = arith.mulf %198, %210 : vector<1x32xf32>
    %c0_147 = arith.constant 0 : index
    %c7_148 = arith.constant 7 : index
    %c0_149 = arith.constant 0 : index
    %212 = vector.load %arg7[%c0_147, %c7_148, %c0_149] : memref<1x8x32xf32, #tpu.memory_space<vmem>>, vector<1x1x32xf32>
    %213 = vector.shape_cast %212 : vector<1x1x32xf32> to vector<1x32xf32>
    %214 = vector.shape_cast %211 : vector<1x32xf32> to vector<1x1x32xf32>
    tpu.vector_store %arg7[%c0_147, %c7_148, %c0_149], %214 {strides = array<i32>} : memref<1x8x32xf32, #tpu.memory_space<vmem>>, vector<1x1x32xf32>,
    return
  }
  func.func @transform_0(%arg0: i32, %arg1: i32) -> (i32, i32, i32) {
    %c0_i32 = arith.constant 0 : i32
    %c0_i32_0 = arith.constant 0 : i32
    %c0_i32_1 = arith.constant 0 : i32
    return %arg0, %c0_i32, %c0_i32_0 : i32, i32, i32
  }
  func.func @transform_1(%arg0: i32, %arg1: i32) -> (i32, i32, i32, i32) {
    %c0_i32 = arith.constant 0 : i32
    %c0_i32_0 = arith.constant 0 : i32
    %c0_i32_1 = arith.constant 0 : i32
    %c0_i32_2 = arith.constant 0 : i32
    return %arg1, %c0_i32, %c0_i32_0, %c0_i32_1 : i32, i32, i32, i32
  }
  func.func @transform_2(%arg0: i32, %arg1: i32) -> (i32, i32, i32) {
    %c0_i32 = arith.constant 0 : i32
    %c0_i32_0 = arith.constant 0 : i32
    %c0_i32_1 = arith.constant 0 : i32
    return %arg1, %c0_i32, %c0_i32_0 : i32, i32, i32
  }
  func.func @transform_3(%arg0: i32, %arg1: i32) -> (i32, i32, i32) {
    %c0_i32 = arith.constant 0 : i32
    %c0_i32_0 = arith.constant 0 : i32
    %c0_i32_1 = arith.constant 0 : i32
    return %arg1, %c0_i32, %c0_i32_0 : i32, i32, i32
  }
  func.func @transform_4(%arg0: i32, %arg1: i32) -> (i32, i32, i32) {
    %c0_i32 = arith.constant 0 : i32
    %c0_i32_0 = arith.constant 0 : i32
    %c0_i32_1 = arith.constant 0 : i32
    return %arg1, %c0_i32, %c0_i32_0 : i32, i32, i32
  }
  func.func @transform_5(%arg0: i32, %arg1: i32) -> (i32, i32, i32) {
    %c0_i32 = arith.constant 0 : i32
    %c0_i32_0 = arith.constant 0 : i32
    %c0_i32_1 = arith.constant 0 : i32
    return %arg0, %c0_i32, %c0_i32_0 : i32, i32, i32
  }
}

module attributes {stable_mosaic.version = 11 : i64} {
  func.func @_linear_kernel(%arg0: i32, %arg1: i32, %arg2: memref<56x32xf32, #tpu.memory_space<vmem>>, %arg3: memref<32x32xf32, #tpu.memory_space<vmem>>, %arg4: memref<1x32xf32, #tpu.memory_space<vmem>>, %arg5: memref<56x32xf32, #tpu.memory_space<vmem>>, %arg6: memref<56x32xf32, #tpu.memory_space<vmem>>) attributes {dimension_semantics = [#tpu.dimension_semantics<parallel>, #tpu.dimension_semantics<arbitrary>], iteration_bounds = array<i64: 1, 1>, scalar_prefetch = 0 : i64, scratch_operands = 1 : i64, tpu.core_type = #tpu.core_type<tc>, window_params = [{transform_indices = @transform_0, window_bounds = array<i64: 56, 32>}, {transform_indices = @transform_1, window_bounds = array<i64: 32, 32>}, {pipeline_mode = #tpu.pipeline_mode<synchronous>, transform_indices = @transform_2, window_bounds = array<i64: 1, 32>}, {transform_indices = @transform_3, window_bounds = array<i64: 56, 32>}]} {
    %c0_i32 = arith.constant 0 : i32
    %0 = arith.cmpi eq, %arg1, %c0_i32 : i32
    %1 = arith.extui %0 : i1 to i32
    %c0_i32_0 = arith.constant 0 : i32
    %2 = arith.cmpi ne, %1, %c0_i32_0 : i32
    scf.if %2 {
      %cst_10 = arith.constant 0.000000e+00 : f32
      %12 = vector.broadcast %cst_10 : f32 to vector<56x32xf32>
      %c0_11 = arith.constant 0 : index
      %c0_12 = arith.constant 0 : index
      %13 = vector.load %arg6[%c0_11, %c0_12] : memref<56x32xf32, #tpu.memory_space<vmem>>, vector<56x32xf32>
      tpu.vector_store %arg6[%c0_11, %c0_12], %12 {strides = array<i32>} : memref<56x32xf32, #tpu.memory_space<vmem>>, vector<56x32xf32>,
    } else {
    }
    %c0 = arith.constant 0 : index
    %c0_1 = arith.constant 0 : index
    %3 = vector.load %arg6[%c0, %c0_1] : memref<56x32xf32, #tpu.memory_space<vmem>>, vector<56x32xf32>
    %c0_2 = arith.constant 0 : index
    %c0_3 = arith.constant 0 : index
    %4 = vector.load %arg2[%c0_2, %c0_3] : memref<56x32xf32, #tpu.memory_space<vmem>>, vector<56x32xf32>
    %c0_4 = arith.constant 0 : index
    %c0_5 = arith.constant 0 : index
    %5 = vector.load %arg3[%c0_4, %c0_5] : memref<32x32xf32, #tpu.memory_space<vmem>>, vector<32x32xf32>
    %cst = arith.constant dense<0.000000e+00> : vector<56x32xf32>
    %6 = tpu.matmul %4, %5, %cst {dimension_numbers = #tpu.dot_dimension_numbers<[1], [0], [0], [1], [0, 0, 1, 1], [], []>} : vector<56x32xf32>, vector<32x32xf32>, vector<56x32xf32> -> vector<56x32xf32>
    %7 = arith.addf %3, %6 : vector<56x32xf32>
    %c0_6 = arith.constant 0 : index
    %c0_7 = arith.constant 0 : index
    %8 = vector.load %arg6[%c0_6, %c0_7] : memref<56x32xf32, #tpu.memory_space<vmem>>, vector<56x32xf32>
    tpu.vector_store %arg6[%c0_6, %c0_7], %7 {strides = array<i32>} : memref<56x32xf32, #tpu.memory_space<vmem>>, vector<56x32xf32>,
    %c0_i32_8 = arith.constant 0 : i32
    %9 = arith.cmpi eq, %arg1, %c0_i32_8 : i32
    %10 = arith.extui %9 : i1 to i32
    %c0_i32_9 = arith.constant 0 : i32
    %11 = arith.cmpi ne, %10, %c0_i32_9 : i32
    scf.if %11 {
      %c0_10 = arith.constant 0 : index
      %c0_11 = arith.constant 0 : index
      %12 = vector.load %arg6[%c0_10, %c0_11] : memref<56x32xf32, #tpu.memory_space<vmem>>, vector<56x32xf32>
      %c0_12 = arith.constant 0 : index
      %c0_13 = arith.constant 0 : index
      %13 = vector.load %arg4[%c0_12, %c0_13] : memref<1x32xf32, #tpu.memory_space<vmem>>, vector<1x32xf32>
      %14 = vector.broadcast %13 : vector<1x32xf32> to vector<56x32xf32>
      %15 = arith.addf %12, %14 : vector<56x32xf32>
      %16 = arith.mulf %15, %15 : vector<56x32xf32>
      %17 = arith.mulf %15, %16 : vector<56x32xf32>
      %cst_14 = arith.constant 4.471500e-02 : f32
      %18 = vector.broadcast %cst_14 : f32 to vector<56x32xf32>
      %19 = arith.mulf %18, %17 : vector<56x32xf32>
      %20 = arith.addf %15, %19 : vector<56x32xf32>
      %cst_15 = arith.constant 0.797884583 : f32
      %21 = vector.broadcast %cst_15 : f32 to vector<56x32xf32>
      %22 = arith.mulf %21, %20 : vector<56x32xf32>
      %23 = math.tanh %22 : vector<56x32xf32>
      %cst_16 = arith.constant 1.000000e+00 : f32
      %24 = vector.broadcast %cst_16 : f32 to vector<56x32xf32>
      %25 = arith.addf %24, %23 : vector<56x32xf32>
      %cst_17 = arith.constant 5.000000e-01 : f32
      %26 = vector.broadcast %cst_17 : f32 to vector<56x32xf32>
      %27 = arith.mulf %26, %25 : vector<56x32xf32>
      %28 = arith.mulf %15, %27 : vector<56x32xf32>
      %c0_18 = arith.constant 0 : index
      %c0_19 = arith.constant 0 : index
      %29 = vector.load %arg5[%c0_18, %c0_19] : memref<56x32xf32, #tpu.memory_space<vmem>>, vector<56x32xf32>
      tpu.vector_store %arg5[%c0_18, %c0_19], %28 {strides = array<i32>} : memref<56x32xf32, #tpu.memory_space<vmem>>, vector<56x32xf32>,
    } else {
    }
    return
  }
  func.func @transform_0(%arg0: i32, %arg1: i32) -> (i32, i32) {
    %c0_i32 = arith.constant 0 : i32
    return %arg0, %arg1 : i32, i32
  }
  func.func @transform_1(%arg0: i32, %arg1: i32) -> (i32, i32) {
    %c0_i32 = arith.constant 0 : i32
    %c0_i32_0 = arith.constant 0 : i32
    return %arg1, %c0_i32 : i32, i32
  }
  func.func @transform_2(%arg0: i32, %arg1: i32) -> (i32, i32) {
    %c0_i32 = arith.constant 0 : i32
    %c0_i32_0 = arith.constant 0 : i32
    %c0_i32_1 = arith.constant 0 : i32
    return %c0_i32, %c0_i32_0 : i32, i32
  }
  func.func @transform_3(%arg0: i32, %arg1: i32) -> (i32, i32) {
    %c0_i32 = arith.constant 0 : i32
    %c0_i32_0 = arith.constant 0 : i32
    return %arg0, %c0_i32 : i32, i32
  }
}

module attributes {stable_mosaic.version = 11 : i64} {
  func.func @_coeff_to_grid_kernel(%arg0: i32, %arg1: i32, %arg2: memref<1x8x32xf32, #tpu.memory_space<vmem>>, %arg3: memref<56x32xf32, #tpu.memory_space<vmem>>, %arg4: memref<256x8xf32, #tpu.memory_space<vmem>>, %arg5: memref<256x56xf32, #tpu.memory_space<vmem>>, %arg6: memref<32x3xf32, #tpu.memory_space<vmem>>, %arg7: memref<1x3xf32, #tpu.memory_space<vmem>>, %arg8: memref<1x256x3xf32, #tpu.memory_space<vmem>>) attributes {dimension_semantics = [#tpu.dimension_semantics<parallel>, #tpu.dimension_semantics<parallel>], iteration_bounds = array<i64: 2, 1>, scalar_prefetch = 0 : i64, scratch_operands = 0 : i64, tpu.core_type = #tpu.core_type<tc>, window_params = [{transform_indices = @transform_0, window_bounds = array<i64: 1, 8, 32>}, {pipeline_mode = #tpu.pipeline_mode<synchronous>, transform_indices = @transform_1, window_bounds = array<i64: 56, 32>}, {transform_indices = @transform_2, window_bounds = array<i64: 256, 8>}, {transform_indices = @transform_3, window_bounds = array<i64: 256, 56>}, {pipeline_mode = #tpu.pipeline_mode<synchronous>, transform_indices = @transform_4, window_bounds = array<i64: 32, 3>}, {pipeline_mode = #tpu.pipeline_mode<synchronous>, transform_indices = @transform_5, window_bounds = array<i64: 1, 3>}, {transform_indices = @transform_6, window_bounds = array<i64: 1, 256, 3>}]} {
    %c0 = arith.constant 0 : index
    %c0_0 = arith.constant 0 : index
    %0 = vector.load %arg6[%c0, %c0_0] : memref<32x3xf32, #tpu.memory_space<vmem>>, vector<32x3xf32>
    %c0_1 = arith.constant 0 : index
    %c0_2 = arith.constant 0 : index
    %c0_3 = arith.constant 0 : index
    %1 = vector.load %arg2[%c0_1, %c0_2, %c0_3] : memref<1x8x32xf32, #tpu.memory_space<vmem>>, vector<1x8x32xf32>
    %2 = vector.shape_cast %1 : vector<1x8x32xf32> to vector<8x32xf32>
    %cst = arith.constant dense<0.000000e+00> : vector<8x3xf32>
    %3 = tpu.matmul %2, %0, %cst {dimension_numbers = #tpu.dot_dimension_numbers<[1], [0], [0], [1], [0, 0, 1, 1], [], []>} : vector<8x32xf32>, vector<32x3xf32>, vector<8x3xf32> -> vector<8x3xf32>
    %c0_4 = arith.constant 0 : index
    %c0_5 = arith.constant 0 : index
    %4 = vector.load %arg3[%c0_4, %c0_5] : memref<56x32xf32, #tpu.memory_space<vmem>>, vector<56x32xf32>
    %cst_6 = arith.constant dense<0.000000e+00> : vector<56x3xf32>
    %5 = tpu.matmul %4, %0, %cst_6 {dimension_numbers = #tpu.dot_dimension_numbers<[1], [0], [0], [1], [0, 0, 1, 1], [], []>} : vector<56x32xf32>, vector<32x3xf32>, vector<56x3xf32> -> vector<56x3xf32>
    %c0_7 = arith.constant 0 : index
    %c0_8 = arith.constant 0 : index
    %6 = vector.load %arg4[%c0_7, %c0_8] : memref<256x8xf32, #tpu.memory_space<vmem>>, vector<256x8xf32>
    %cst_9 = arith.constant dense<0.000000e+00> : vector<256x3xf32>
    %7 = tpu.matmul %6, %3, %cst_9 {dimension_numbers = #tpu.dot_dimension_numbers<[1], [0], [0], [1], [0, 0, 1, 1], [], []>} : vector<256x8xf32>, vector<8x3xf32>, vector<256x3xf32> -> vector<256x3xf32>
    %c0_10 = arith.constant 0 : index
    %c0_11 = arith.constant 0 : index
    %8 = vector.load %arg5[%c0_10, %c0_11] : memref<256x56xf32, #tpu.memory_space<vmem>>, vector<256x56xf32>
    %cst_12 = arith.constant dense<0.000000e+00> : vector<256x3xf32>
    %9 = tpu.matmul %8, %5, %cst_12 {dimension_numbers = #tpu.dot_dimension_numbers<[1], [0], [0], [1], [0, 0, 1, 1], [], []>} : vector<256x56xf32>, vector<56x3xf32>, vector<256x3xf32> -> vector<256x3xf32>
    %10 = arith.addf %7, %9 : vector<256x3xf32>
    %c0_13 = arith.constant 0 : index
    %c0_14 = arith.constant 0 : index
    %11 = vector.load %arg7[%c0_13, %c0_14] : memref<1x3xf32, #tpu.memory_space<vmem>>, vector<1x3xf32>
    %12 = vector.broadcast %11 : vector<1x3xf32> to vector<256x3xf32>
    %13 = arith.addf %10, %12 : vector<256x3xf32>
    %c0_15 = arith.constant 0 : index
    %c0_16 = arith.constant 0 : index
    %c0_17 = arith.constant 0 : index
    %14 = vector.load %arg8[%c0_15, %c0_16, %c0_17] : memref<1x256x3xf32, #tpu.memory_space<vmem>>, vector<1x256x3xf32>
    %15 = vector.shape_cast %14 : vector<1x256x3xf32> to vector<256x3xf32>
    %16 = vector.shape_cast %13 : vector<256x3xf32> to vector<1x256x3xf32>
    tpu.vector_store %arg8[%c0_15, %c0_16, %c0_17], %16 {strides = array<i32>} : memref<1x256x3xf32, #tpu.memory_space<vmem>>, vector<1x256x3xf32>,
    return
  }
  func.func @transform_0(%arg0: i32, %arg1: i32) -> (i32, i32, i32) {
    %c0_i32 = arith.constant 0 : i32
    %c0_i32_0 = arith.constant 0 : i32
    %c0_i32_1 = arith.constant 0 : i32
    return %arg0, %c0_i32, %c0_i32_0 : i32, i32, i32
  }
  func.func @transform_1(%arg0: i32, %arg1: i32) -> (i32, i32) {
    %c0_i32 = arith.constant 0 : i32
    %c0_i32_0 = arith.constant 0 : i32
    %c0_i32_1 = arith.constant 0 : i32
    return %c0_i32, %c0_i32_0 : i32, i32
  }
  func.func @transform_2(%arg0: i32, %arg1: i32) -> (i32, i32) {
    %c0_i32 = arith.constant 0 : i32
    %c0_i32_0 = arith.constant 0 : i32
    return %arg1, %c0_i32 : i32, i32
  }
  func.func @transform_3(%arg0: i32, %arg1: i32) -> (i32, i32) {
    %c0_i32 = arith.constant 0 : i32
    %c0_i32_0 = arith.constant 0 : i32
    return %arg1, %c0_i32 : i32, i32
  }
  func.func @transform_4(%arg0: i32, %arg1: i32) -> (i32, i32) {
    %c0_i32 = arith.constant 0 : i32
    %c0_i32_0 = arith.constant 0 : i32
    %c0_i32_1 = arith.constant 0 : i32
    return %c0_i32, %c0_i32_0 : i32, i32
  }
  func.func @transform_5(%arg0: i32, %arg1: i32) -> (i32, i32) {
    %c0_i32 = arith.constant 0 : i32
    %c0_i32_0 = arith.constant 0 : i32
    %c0_i32_1 = arith.constant 0 : i32
    return %c0_i32, %c0_i32_0 : i32, i32
  }
  func.func @transform_6(%arg0: i32, %arg1: i32) -> (i32, i32, i32) {
    %c0_i32 = arith.constant 0 : i32
    %c0_i32_0 = arith.constant 0 : i32
    return %arg0, %arg1, %c0_i32 : i32, i32, i32
  }
}

</mosaic_0001>

<bundles_post_ra>
// kernel: spherical_fno_forward.4
= control target key start
LH: loop header
LB: loop body
LE: loop exit
PB: predicated region body
PF: predicated region fallthrough
CT: control target
= control target key end

     0   :  { %s693_s15 = smov 0   ;;  %s695_s16 = smov 0   ;;  %s779_s0 = inlined_call_operand.vmem [shape: f32[2,256,4], index: 0, kind: input, shape index: {}]   ;;  %s780_s1 = inlined_call_operand.vmem [shape: f32[8,256], index: 1, kind: input, shape index: {}]   ;;  %s781_s2 = inlined_call_operand.vmem [shape: f32[4,32], index: 2, kind: input, shape index: {}]   ;;  %s782_s3 = inlined_call_operand.vmem [shape: f32[8,32], index: 3, kind: input, shape index: {}]   ;;  %s783_s4 = inlined_call_operand.vmem [shape: f32[2,8,32], index: 4, kind: output, shape index: {}]  }
   0x1   :  { %s697_s17 = smov 0  }
   0x2 LB: > { %s26_s18 = sadd.s32 1, %s660_s16  ;;  %p533_p0 = scmp.ge.s32.totalorder %s664_s17, 1  ;;  %s664_s17 = sphi %s697_s17, %s14_s17   ;;  %s660_s16 = sphi %s695_s16, %s785_s16   ;;  %s656_s15 = sphi %s693_s15, %s784_s15  }
   0x3   : > { %p28_p1 = scmp.ge.s32.totalorder %s26_s18, 2  ;;  %p192_p2 = scmp.lt.s32.totalorder %s664_s17, 3 }
   0x5   : > { %s787_s18 = smov (%p28_p1, %s26_s18), 0  ;;  %p193_p3 = pnand %p533_p0, %p192_p2 }
   0x6   : > { %p227_p4 = scmp.lt.s32.totalorder (!%p193_p3), %s656_s15, 1  ;;  %v254_v0 = vld [vmem:[%s780_s1 + $0x8] sm:$0xff] (!%p193_p3)  ;;  %v253_v49 = vld [vmem:[%s780_s1] sm:$0xff] (!%p193_p3)  ;;  %vm250_vm0 = vcmask (!%p193_p3), 31744   ;;  %v666_v50 = vmov (!%p193_p3), 0.0   ;;  %vm369_vm1 = vcmask (!%p193_p3), 1043456  }
   0x7   : > { %196 = sbr.rel (%p193_p3) target bundleno = 492 (0x1ec), region = 36  ;;  %351 = vmatprep.mubr.f32.mxu0 (!%p193_p3), %v254_v0  ;;  %251 = vst.msk [vmem:[#allocation2] sm:$0xff] (!%p193_p3), %vm250_vm0, %v666_v50  ;;  %579 = vmatprep.subr.mxu1 (!%p193_p3), %v666_v50  ;;  %v364_v51 = vld [vmem:[%s781_s2] sm:$0xf] (!%p193_p3)  ;;  %vm667_vm2 = vmmov (!%p193_p3), 0   ;;  %vm443_vm3 = vcmask (!%p193_p3), 261120  }
   0x8   : > { %580 = vmatpush3.msk.msra.mxu1 (!%p193_p3), %vm369_vm1, %v364_v51  ;;  %581 = vmatprep.mubr.msk.f32.mxu1 (!%p193_p3), %vm667_vm2, %v666_v50  ;;  %v365_v58 = vld [vmem:[%s782_s3] sm:$0xff] (!%p193_p3) }
   0xe   : > { %s789_s15 = smov (!%p227_p4, %s656_s15), 1  ;;  %v252_v54 = vld [vmem:[#allocation2] sm:$0xff] }
   0xf   : > { %s541_s21 = sshll.u32 %s789_s15, 8  ;;  %s536_s29 = sshll.u32 %s789_s15, 3 }
  0x10   : > { %s720_s24 = scalar_lea.vmem %s779_s0, %s541_s21  ;;  %s245_s8 = scalar_lea.vmem %s783_s4, %s536_s29 }
  0x11   : > { %v271_v1 = vld [vmem:[%s720_s24 + $0x80] sm:$0xff]  ;;  %v272_v2 = vld [vmem:[%s720_s24 + $0x88] sm:$0xff]  ;;  %v273_v6 = vld [vmem:[%s720_s24 + $0x90] sm:$0xff] }
  0x12   : > { %v255_v3 = vld [vmem:[%s720_s24] sm:$0xff]  ;;  %v584_v4 = vpack.c.bf16 %v272_v2, %v271_v1  ;;  %v256_v5 = vld [vmem:[%s720_s24 + $0x8] sm:$0xff]  ;;  %v274_v7 = vld [vmem:[%s720_s24 + $0x98] sm:$0xff] }
  0x13   : > { %v586_v8 = vpack.c.bf16 %v256_v5, %v255_v3  ;;  %v588_v9 = vpack.c.bf16 %v274_v7, %v273_v6  ;;  %v257_v10 = vld [vmem:[%s720_s24 + $0x10] sm:$0xff]  ;;  %v258_v11 = vld [vmem:[%s720_s24 + $0x18] sm:$0xff]  ;;  %v275_v12 = vld [vmem:[%s720_s24 + $0xa0] sm:$0xff] }
  0x14   : > { %585 = vmatprep.subr.bf16.mxu0 %v584_v4  ;;  %v276_v13 = vld [vmem:[%s720_s24 + $0xa8] sm:$0xff]  ;;  %v590_v14 = vpack.c.bf16 %v258_v11, %v257_v10  ;;  %v259_v16 = vld [vmem:[%s720_s24 + $0x20] sm:$0xff]  ;;  %v277_v18 = vld [vmem:[%s720_s24 + $0xb0] sm:$0xff] }
  0x15   : > { %587 = vmatpush3.bf16.msra.mxu0 %v586_v8  ;;  %v592_v15 = vpack.c.bf16 %v276_v13, %v275_v12  ;;  %v260_v17 = vld [vmem:[%s720_s24 + $0x28] sm:$0xff]  ;;  %v278_v19 = vld [vmem:[%s720_s24 + $0xb8] sm:$0xff]  ;;  %v261_v22 = vld [vmem:[%s720_s24 + $0x30] sm:$0xff] }
  0x16   : > { %589 = vmatprep.subr.bf16.mxu0 %v588_v9  ;;  %v594_v20 = vpack.c.bf16 %v260_v17, %v259_v16  ;;  %v596_v21 = vpack.c.bf16 %v278_v19, %v277_v18  ;;  %v262_v23 = vld [vmem:[%s720_s24 + $0x38] sm:$0xff]  ;;  %v279_v24 = vld [vmem:[%s720_s24 + $0xc0] sm:$0xff]  ;;  %v280_v25 = vld [vmem:[%s720_s24 + $0xc8] sm:$0xff] }
  0x17   : > { %v598_v26 = vpack.c.bf16 %v262_v23, %v261_v22  ;;  %v600_v27 = vpack.c.bf16 %v280_v25, %v279_v24  ;;  %v263_v28 = vld [vmem:[%s720_s24 + $0x40] sm:$0xff]  ;;  %v264_v29 = vld [vmem:[%s720_s24 + $0x48] sm:$0xff]  ;;  %v281_v30 = vld [vmem:[%s720_s24 + $0xd0] sm:$0xff] }
  0x18   : > { %v282_v31 = vld [vmem:[%s720_s24 + $0xd8] sm:$0xff]  ;;  %v602_v32 = vpack.c.bf16 %v264_v29, %v263_v28  ;;  %v265_v34 = vld [vmem:[%s720_s24 + $0x50] sm:$0xff]  ;;  %v283_v36 = vld [vmem:[%s720_s24 + $0xe0] sm:$0xff] }
  0x19   : > { %591 = vmatpush3.bf16.msra.mxu0 %v590_v14  ;;  %v604_v33 = vpack.c.bf16 %v282_v31, %v281_v30  ;;  %v266_v35 = vld [vmem:[%s720_s24 + $0x58] sm:$0xff]  ;;  %v284_v37 = vld [vmem:[%s720_s24 + $0xe8] sm:$0xff]  ;;  %v267_v40 = vld [vmem:[%s720_s24 + $0x60] sm:$0xff] }
  0x1a   : > { %593 = vmatprep.subr.bf16.mxu0 %v592_v15  ;;  %v606_v38 = vpack.c.bf16 %v266_v35, %v265_v34  ;;  %v608_v39 = vpack.c.bf16 %v284_v37, %v283_v36  ;;  %v268_v41 = vld [vmem:[%s720_s24 + $0x68] sm:$0xff]  ;;  %v285_v42 = vld [vmem:[%s720_s24 + $0xf0] sm:$0xff]  ;;  %v286_v43 = vld [vmem:[%s720_s24 + $0xf8] sm:$0xff] }
  0x1b   : > { %v610_v44 = vpack.c.bf16 %v268_v41, %v267_v40  ;;  %v612_v45 = vpack.c.bf16 %v286_v43, %v285_v42  ;;  %v269_v46 = vld [vmem:[%s720_s24 + $0x70] sm:$0xff]  ;;  %v270_v47 = vld [vmem:[%s720_s24 + $0x78] sm:$0xff] }
  0x1c   : > { %v614_v48 = vpack.c.bf16 %v270_v47, %v269_v46 }
  0x1d   : > { %595 = vmatpush3.bf16.msra.mxu0 %v594_v20 }
  0x1e   : > { %597 = vmatprep.subr.bf16.mxu0 %v596_v21 }
  0x21   : > { %599 = vmatpush3.bf16.msra.mxu0 %v598_v26 }
  0x22   : > { %601 = vmatprep.subr.bf16.mxu0 %v600_v27 }
  0x25   : > { %603 = vmatpush3.bf16.msra.mxu0 %v602_v32 }
  0x26   : > { %605 = vmatprep.subr.bf16.mxu0 %v604_v33 }
  0x29   : > { %607 = vmatpush3.bf16.msra.mxu0 %v606_v38 }
  0x2a   : > { %609 = vmatprep.subr.bf16.mxu0 %v608_v39 }
  0x2d   : > { %611 = vmatpush3.bf16.msra.mxu0 %v610_v44 }
  0x2e   : > { %613 = vmatprep.subr.bf16.mxu0 %v612_v45 }
  0x31   : > { %615 = vmatpush3.bf16.msra.mxu0 %v614_v48 }
  0x34   : > { %352 = vmatmul.mubr.f32.vlgmr.msra.gmra.mrb[0].mxu0 %v253_v49 }
 0x107   : > { %v574_v52 = vpop.f32.mrb[0].mxu0 }
 0x108   : > { %v575_v53 = vpop.f32.mrb[1].mxu0 }
 0x109   : > { %v576_v55 = vadd.f32 %v575_v53, %v574_v52 }
 0x10b   : > { %v357_v56 = vadd.f32 %v576_v55, %v252_v54 }
 0x10d   : > { %359 = vst.msk [vmem:[#allocation2] sm:$0xff] %vm250_vm0, %v357_v56 }
 0x114   : > { %v363_v57 = vld [vmem:[#allocation2] sm:$0xff] }
 0x115   : > { %582 = vmatmul.mubr.msk.f32.vlgmr.msra.gmra.mrb[0].mxu1 %vm250_vm0, %v363_v57 }
 0x1e8   : > { %v439_v59 = vpop.f32.mrb[0].mxu1 }
 0x1e9   : > { %v440_v60 = vadd.f32 %v439_v59, %v365_v58  ;;  %v583_v61 = vpop.f32.mrb[1].mxu1 }
 0x1eb   : > { %444 = vst.msk [vmem:[%s245_s8] sm:$0xff] %vm443_vm3, %v440_v60 }
 0x1ec PF: > { %s14_s17 = sadd.s32 1, %s664_s17   ;;  %s784_s15 = smov %s660_s16 }
 0x1ed   : > { %p11_p5 = scmp.ge.s32.totalorder %s14_s17, 4   ;;  %s785_s16 = smov %s787_s18 }
 0x1ef   :  { %13 = sbr.rel (!%p11_p5) target bundleno = 2 (0x2), region = 77 }

// kernel: spherical_fno_forward.5
= control target key start
LH: loop header
LB: loop body
LE: loop exit
PB: predicated region body
PF: predicated region fallthrough
CT: control target
= control target key end

     0   :  { %s2274_s18 = smov 0   ;;  %s2276_s19 = smov 0   ;;  %s2540_s0 = inlined_call_operand.vmem [shape: f32[2,8,32], index: 0, kind: input, shape index: {}]   ;;  %s2541_s1 = inlined_call_operand.vmem [shape: f32[2,8,32,32], index: 1, kind: input, shape index: {}]   ;;  %s2542_s2 = inlined_call_operand.vmem [shape: f32[2,8,32], index: 2, kind: input, shape index: {}]   ;;  %s2543_s3 = inlined_call_operand.vmem [shape: f32[2,32,32], index: 3, kind: input, shape index: {}]   ;;  %s2544_s4 = inlined_call_operand.vmem [shape: f32[2,1,32], index: 4, kind: input, shape index: {}]   ;;  %s2545_s5 = inlined_call_operand.vmem [shape: f32[2,8,32], index: 5, kind: output, shape index: {}]  }
   0x1   :  { %s2278_s20 = smov 0   ;;  %s2280_s21 = smov 0  }
   0x2   :  { %s2282_s22 = smov 0  }
   0x3 LB: > { %s24_s23 = sadd.s32 1, %s2231_s20  ;;  %s27_s24 = sadd.s32 1, %s2235_s21  ;;  %s2239_s22 = sphi %s2282_s22, %s15_s22   ;;  %s2235_s21 = sphi %s2280_s21, %s2549_s21   ;;  %s2231_s20 = sphi %s2278_s20, %s2548_s20   ;;  %s2227_s19 = sphi %s2276_s19, %s2547_s19   ;;  %s2223_s18 = sphi %s2274_s18, %s2546_s18  }
   0x4   : > { %p25_p0 = scmp.ge.s32.totalorder %s24_s23, 2  ;;  %p1733_p1 = scmp.ge.s32.totalorder %s2239_s22, 1 }
   0x5   : > { %p235_p2 = scmp.lt.s32.totalorder %s2239_s22, 5 }
   0x6   : > { %s2551_s23 = smov (%p25_p0, %s24_s23), 0  ;;  %s2553_s24 = smov (!%p25_p0, %s27_s24), %s2235_s21 }
   0x7   : > { %p236_p3 = pnand %p1733_p1, %p235_p2  ;;  %p29_p4 = scmp.ge.s32.totalorder %s2553_s24, 2 }
   0x8   : > { %p278_p5 = scmp.lt.s32.totalorder (!%p236_p3), %s2227_s19, 1  ;;  %p282_p6 = scmp.lt.s32.totalorder (!%p236_p3), %s2223_s18, 1 }
   0x9   : > { %s2555_s24 = smov (%p29_p4, %s2553_s24), 0  ;;  %239 = sbr.rel (%p236_p3) target bundleno = 547 (0x223), region = 40 }
   0xa   : > { %p1741_p7 = scmp.ne.s32.totalorder (!%p236_p3), %s2223_s18, 0 }
  0x10   : > { %s2557_s19 = smov (!%p278_p5, %s2227_s19), 1  ;;  %vm308_vm0 = vcmask (!%p1741_p7), 261120  }
  0x11   : > { %s2308_s25 = scalar_select %p282_p6, %s2223_s18, 1 }
  0x12   : > { %s1734_s26 = sshll.u32 %s2557_s19, 3  ;;  %306 = sbr.rel (%p1741_p7) target bundleno = 25 (0x19), region = 44 }
  0x13   : > { %s281_s29 = scalar_lea.vmem %s2540_s0, %s1734_s26  ;;  %s1788_s30 = sshll.u32 %s2308_s25, 8 }
  0x14   : > { %s2317_s8 = scalar_lea.vmem %s2541_s1, %s1788_s30  ;;  %s1737_s9 = sshll.u32 %s2308_s25, 3  ;;  %v307_v0 = vld [vmem:[%s281_s29] sm:$0xff] (!%p1741_p7) }
  0x15   : > { %s2323_s12 = scalar_lea.vmem %s2542_s2, %s1737_s9  ;;  %s1789_s13 = sshll.u32 %s2308_s25, 5 }
  0x16   : > { %s2329_s16 = scalar_lea.vmem %s2543_s3, %s1789_s13  ;;  %s298_s27 = scalar_lea.vmem %s2544_s4, %s2308_s25 }
  0x17   : > { %s2338_s30 = scalar_lea.vmem %s2545_s5, %s1734_s26 }
  0x18   : > { %309 = vst.msk [vmem:[%s2338_s30] sm:$0xff] (!%p1741_p7), %vm308_vm0, %v307_v0 }
  0x19 PF: > { %v316_v1 = vld [vmem:[%s2317_s8] sm:$0xff]  ;;  %v317_v2 = vld [vmem:[%s2317_s8 + $0x8] sm:$0xff]  ;;  %v318_v3 = vld [vmem:[%s2317_s8 + $0x10] sm:$0xff]  ;;  %v2241_v4 = vmov 0.0|0.0   ;;  %vm2242_vm1 = vmmov 0   ;;  %v2243_v7 = vmov 0.0  }
  0x1a   : > { %2046 = vmatprep.subr.bf16.mxu0 %v2241_v4  ;;  %v2047_v5 = vpack.c.bf16 %v317_v2, %v316_v1  ;;  %v319_v6 = vld [vmem:[%s2317_s8 + $0x18] sm:$0xff]  ;;  %1878 = vmatprep.mubr.msk.f32.mxu0 %vm2242_vm1, %v2243_v7  ;;  %v1744_v9 = vld [vmem:[%s2317_s8 + $0x20] sm:$0xff]  ;;  %v1745_v10 = vld [vmem:[%s2317_s8 + $0x28] sm:$0xff]  ;;  %vm321_vm2 = vcmask 261120   ;;  %vm477_vm3 = vcmask 253952  }
  0x1b   : > { %2052 = vmatprep.subr.bf16.mxu1 %v2241_v4  ;;  %1889 = vmatprep.mubr.msk.f32.mxu1 %vm2242_vm1, %v2243_v7  ;;  %v2050_v8 = vpack.c.bf16 %v319_v6, %v318_v3  ;;  %v2059_v12 = vpack.c.bf16 %v1745_v10, %v1744_v9  ;;  %v1746_v13 = vld [vmem:[%s2317_s8 + $0x30] sm:$0xff]  ;;  %v1747_v14 = vld [vmem:[%s2317_s8 + $0x38] sm:$0xff]  ;;  %v1750_v16 = vld [vmem:[%s2317_s8 + $0x40] sm:$0xff] }
  0x1c   : > { %2048 = vmatpush3.bf16.msra.mxu0 %v2047_v5  ;;  %v2062_v15 = vpack.c.bf16 %v1747_v14, %v1746_v13  ;;  %v1751_v17 = vld [vmem:[%s2317_s8 + $0x48] sm:$0xff]  ;;  %v310_v18 = vld [vmem:[%s2329_s16] sm:$0xff]  ;;  %v1752_v23 = vld [vmem:[%s2317_s8 + $0x50] sm:$0xff] }
  0x1d   : > { %2049 = vmatprep.subr.bf16.mxu0 %v2241_v4  ;;  %v311_v19 = vld [vmem:[%s2329_s16 + $0x8] sm:$0xff]  ;;  %v2071_v22 = vpack.c.bf16 %v1751_v17, %v1750_v16  ;;  %v1753_v24 = vld [vmem:[%s2317_s8 + $0x58] sm:$0xff]  ;;  %v1756_v26 = vld [vmem:[%s2317_s8 + $0x60] sm:$0xff] }
  0x1e   : > { %v2367_v20 = vpack.c.bf16 %v311_v19, %v310_v18  ;;  %v2074_v25 = vpack.c.bf16 %v1753_v24, %v1752_v23  ;;  %v1757_v27 = vld [vmem:[%s2317_s8 + $0x68] sm:$0xff]  ;;  %v1758_v30 = vld [vmem:[%s2317_s8 + $0x70] sm:$0xff]  ;;  %v1759_v31 = vld [vmem:[%s2317_s8 + $0x78] sm:$0xff] }
  0x1f   : > { %v315_v11 = vld [vmem:[%s2338_s30] sm:$0x1]  ;;  %v479_v21 = vld [vmem:[%s2338_s30 + $0x1] sm:$0x1]  ;;  %v642_v28 = vld [vmem:[%s2338_s30 + $0x2] sm:$0x1]  ;;  %v2083_v29 = vpack.c.bf16 %v1757_v27, %v1756_v26  ;;  %v2086_v32 = vpack.c.bf16 %v1759_v31, %v1758_v30 }
  0x20   : > { %2051 = vmatpush3.bf16.msra.mxu0 %v2050_v8  ;;  %2054 = vmatpush3.bf16.msra.mxu1 %v2367_v20  ;;  %v1762_v33 = vld [vmem:[%s2317_s8 + $0x80] sm:$0xff]  ;;  %v1763_v34 = vld [vmem:[%s2317_s8 + $0x88] sm:$0xff]  ;;  %v1764_v37 = vld [vmem:[%s2317_s8 + $0x90] sm:$0xff] }
  0x21   : > { %2058 = vmatprep.subr.bf16.mxu0 %v2241_v4  ;;  %2055 = vmatprep.subr.bf16.mxu1 %v2241_v4  ;;  %v805_v35 = vld [vmem:[%s2338_s30 + $0x3] sm:$0x1]  ;;  %v2095_v36 = vpack.c.bf16 %v1763_v34, %v1762_v33  ;;  %v1765_v38 = vld [vmem:[%s2317_s8 + $0x98] sm:$0xff]  ;;  %v1769_v41 = vld [vmem:[%s2317_s8 + $0xa8] sm:$0xff] }
  0x22   : > { %v2098_v39 = vpack.c.bf16 %v1765_v38, %v1764_v37  ;;  %v1768_v40 = vld [vmem:[%s2317_s8 + $0xa0] sm:$0xff]  ;;  %v1770_v44 = vld [vmem:[%s2317_s8 + $0xb0] sm:$0xff]  ;;  %v1771_v45 = vld [vmem:[%s2317_s8 + $0xb8] sm:$0xff] }
  0x23   : > { %1879 = vmatmul.mubr.msk.f32.vlgmr.msra.gmra.mrb[0].mxu0 %vm321_vm2, %v315_v11  ;;  %v968_v42 = vld [vmem:[%s2338_s30 + $0x4] sm:$0x1]  ;;  %v2107_v43 = vpack.c.bf16 %v1769_v41, %v1768_v40  ;;  %v2110_v46 = vpack.c.bf16 %v1771_v45, %v1770_v44  ;;  %v1775_v48 = vld [vmem:[%s2317_s8 + $0xc8] sm:$0xff]  ;;  %v1131_v49 = vld [vmem:[%s2338_s30 + $0x5] sm:$0x1] }
  0x24   : > { %2060 = vmatpush3.bf16.msra.mxu0 %v2059_v12  ;;  %1900 = vmatprep.mubr.msk.f32.mxu0 %vm2242_vm1, %v2243_v7  ;;  %v1774_v47 = vld [vmem:[%s2317_s8 + $0xc0] sm:$0xff]  ;;  %v1776_v51 = vld [vmem:[%s2317_s8 + $0xd0] sm:$0xff]  ;;  %v1777_v52 = vld [vmem:[%s2317_s8 + $0xd8] sm:$0xff] }
  0x25   : > { %2061 = vmatprep.subr.bf16.mxu0 %v2241_v4  ;;  %v2119_v50 = vpack.c.bf16 %v1775_v48, %v1774_v47  ;;  %v2122_v53 = vpack.c.bf16 %v1777_v52, %v1776_v51  ;;  %v1780_v54 = vld [vmem:[%s2317_s8 + $0xe0] sm:$0xff]  ;;  %v1781_v55 = vld [vmem:[%s2317_s8 + $0xe8] sm:$0xff]  ;;  %v1782_v58 = vld [vmem:[%s2317_s8 + $0xf0] sm:$0xff] }
  0x26   : > { %v1294_v56 = vld [vmem:[%s2338_s30 + $0x6] sm:$0x1]  ;;  %v2131_v57 = vpack.c.bf16 %v1781_v55, %v1780_v54  ;;  %v1783_v59 = vld [vmem:[%s2317_s8 + $0xf8] sm:$0xff]  ;;  %v1457_v61 = vld [vmem:[%s2338_s30 + $0x7] sm:$0x1] }
  0x27   : > { %v2134_v60 = vpack.c.bf16 %v1783_v59, %v1782_v58  ;;  %v312_v62 = vld [vmem:[%s2329_s16 + $0x10] sm:$0xff]  ;;  %v313_v63 = vld [vmem:[%s2329_s16 + $0x18] sm:$0xff]  ;;  %v320_v1 = vld [vmem:[%s2323_s12] sm:$0x1] }
  0x28   : > { %2063 = vmatpush3.bf16.msra.mxu0 %v2062_v15  ;;  %v2433_v0 = vpack.c.bf16 %v313_v63, %v312_v62  ;;  %v485_v6 = vld [vmem:[%s2323_s12 + $0x1] sm:$0x1]  ;;  %v648_v11 = vld [vmem:[%s2323_s12 + $0x2] sm:$0x1]  ;;  %v811_v15 = vld [vmem:[%s2323_s12 + $0x3] sm:$0x1] }
  0x29   : > { %2070 = vmatprep.subr.bf16.mxu0 %v2241_v4  ;;  %v974_v19 = vld [vmem:[%s2323_s12 + $0x4] sm:$0x1]  ;;  %v1137_v24 = vld [vmem:[%s2323_s12 + $0x5] sm:$0x1] }
  0x2a   : > { %2057 = vmatpush3.bf16.msra.mxu1 %v2433_v0 }
  0x2b   : > { %1901 = vmatmul.mubr.msk.f32.vlgmr.msra.gmra.mrb[2].mxu0 %vm321_vm2, %v479_v21  ;;  %2064 = vmatprep.subr.bf16.mxu1 %v2241_v4 }
  0x2c   : > { %2072 = vmatpush3.bf16.msra.mxu0 %v2071_v22  ;;  %1922 = vmatprep.mubr.msk.f32.mxu0 %vm2242_vm1, %v2243_v7 }
  0x2d   : > { %2073 = vmatprep.subr.bf16.mxu0 %v2241_v4 }
  0x30   : > { %2075 = vmatpush3.bf16.msra.mxu0 %v2074_v25 }
  0x31   : > { %2082 = vmatprep.subr.bf16.mxu0 %v2241_v4 }
  0x33   : > { %1923 = vmatmul.mubr.msk.f32.vlgmr.msra.gmra.mrb[4].mxu0 %vm321_vm2, %v642_v28  ;;  %v1300_v28 = vld [vmem:[%s2323_s12 + $0x6] sm:$0x1] }
  0x34   : > { %2084 = vmatpush3.bf16.msra.mxu0 %v2083_v29  ;;  %1944 = vmatprep.mubr.msk.f32.mxu0 %vm2242_vm1, %v2243_v7 }
  0x35   : > { %2085 = vmatprep.subr.bf16.mxu0 %v2241_v4 }
  0x38   : > { %2087 = vmatpush3.bf16.msra.mxu0 %v2086_v32  ;;  %v1463_v32 = vld [vmem:[%s2323_s12 + $0x7] sm:$0x1] }
  0x39   : > { %2094 = vmatprep.subr.bf16.mxu0 %v2241_v4 }
  0x3b   : > { %1945 = vmatmul.mubr.msk.f32.vlgmr.msra.gmra.mrb[6].mxu0 %vm321_vm2, %v805_v35 }
  0x3c   : > { %2096 = vmatpush3.bf16.msra.mxu0 %v2095_v36  ;;  %1966 = vmatprep.mubr.msk.f32.mxu0 %vm2242_vm1, %v2243_v7  ;;  %v2499_v36 = vld [vmem:[%s298_s27] sm:$0x1] }
  0x3d   : > { %2097 = vmatprep.subr.bf16.mxu0 %v2241_v4 }
  0x40   : > { %2099 = vmatpush3.bf16.msra.mxu0 %v2098_v39 }
  0x41   : > { %2106 = vmatprep.subr.bf16.mxu0 %v2241_v4 }
  0x43   : > { %1967 = vmatmul.mubr.msk.f32.vlgmr.msra.gmra.mrb[8].mxu0 %vm321_vm2, %v968_v42 }
  0x44   : > { %2108 = vmatpush3.bf16.msra.mxu0 %v2107_v43  ;;  %1988 = vmatprep.mubr.msk.f32.mxu0 %vm2242_vm1, %v2243_v7 }
  0x45   : > { %2109 = vmatprep.subr.bf16.mxu0 %v2241_v4 }
  0x48   : > { %2111 = vmatpush3.bf16.msra.mxu0 %v2110_v46 }
  0x49   : > { %2118 = vmatprep.subr.bf16.mxu0 %v2241_v4 }
  0x4b   : > { %1989 = vmatmul.mubr.msk.f32.vlgmr.msra.gmra.mrb[10].mxu0 %vm321_vm2, %v1131_v49 }
  0x4c   : > { %2120 = vmatpush3.bf16.msra.mxu0 %v2119_v50  ;;  %2010 = vmatprep.mubr.msk.f32.mxu0 %vm2242_vm1, %v2243_v7 }
  0x4d   : > { %2121 = vmatprep.subr.bf16.mxu0 %v2241_v4 }
  0x50   : > { %2123 = vmatpush3.bf16.msra.mxu0 %v2122_v53 }
  0x51   : > { %2130 = vmatprep.subr.bf16.mxu0 %v2241_v4 }
  0x53   : > { %2011 = vmatmul.mubr.msk.f32.vlgmr.msra.gmra.mrb[12].mxu0 %vm321_vm2, %v1294_v56 }
  0x54   : > { %2132 = vmatpush3.bf16.msra.mxu0 %v2131_v57  ;;  %2032 = vmatprep.mubr.msk.f32.mxu0 %vm2242_vm1, %v2243_v7 }
  0x55   : > { %2133 = vmatprep.subr.bf16.mxu0 %v2241_v4 }
  0x58   : > { %2135 = vmatpush3.bf16.msra.mxu0 %v2134_v60 }
  0x5b   : > { %2033 = vmatmul.mubr.msk.f32.vlgmr.msra.gmra.mrb[14].mxu0 %vm321_vm2, %v1457_v61 }
  0xf6   : > { %v391_v2 = vpop.f32.mrb[0].mxu0 }
  0xf7   : > { %v392_v3 = vadd.f32 %v391_v2, %v320_v1  ;;  %v1880_v5 = vpop.f32.mrb[1].mxu0 }
  0xf9   : > { %1890 = vmatmul.mubr.msk.f32.vlgmr.msra.gmra.mrb[0].mxu1 %vm321_vm2, %v392_v3 }
  0xfa   : > { %2066 = vmatpush3.bf16.msra.mxu1 %v2367_v20  ;;  %1911 = vmatprep.mubr.msk.f32.mxu1 %vm2242_vm1, %v2243_v7 }
  0xfb   : > { %2067 = vmatprep.subr.bf16.mxu1 %v2241_v4 }
  0xfe   : > { %v555_v8 = vpop.f32.mrb[2].mxu0  ;;  %2069 = vmatpush3.bf16.msra.mxu1 %v2433_v0 }
  0xff   : > { %v556_v9 = vadd.f32 %v555_v8, %v485_v6  ;;  %v1902_v10 = vpop.f32.mrb[3].mxu0  ;;  %2076 = vmatprep.subr.bf16.mxu1 %v2241_v4 }
 0x101   : > { %1912 = vmatmul.mubr.msk.f32.vlgmr.msra.gmra.mrb[2].mxu1 %vm321_vm2, %v556_v9 }
 0x102   : > { %2078 = vmatpush3.bf16.msra.mxu1 %v2367_v20  ;;  %1933 = vmatprep.mubr.msk.f32.mxu1 %vm2242_vm1, %v2243_v7 }
 0x103   : > { %2079 = vmatprep.subr.bf16.mxu1 %v2241_v4 }
 0x106   : > { %v718_v12 = vpop.f32.mrb[4].mxu0  ;;  %2081 = vmatpush3.bf16.msra.mxu1 %v2433_v0 }
 0x107   : > { %v719_v13 = vadd.f32 %v718_v12, %v648_v11  ;;  %v1924_v14 = vpop.f32.mrb[5].mxu0  ;;  %2088 = vmatprep.subr.bf16.mxu1 %v2241_v4 }
 0x109   : > { %1934 = vmatmul.mubr.msk.f32.vlgmr.msra.gmra.mrb[4].mxu1 %vm321_vm2, %v719_v13 }
 0x10a   : > { %2090 = vmatpush3.bf16.msra.mxu1 %v2367_v20  ;;  %1955 = vmatprep.mubr.msk.f32.mxu1 %vm2242_vm1, %v2243_v7 }
 0x10b   : > { %2091 = vmatprep.subr.bf16.mxu1 %v2241_v4 }
 0x10e   : > { %v881_v16 = vpop.f32.mrb[6].mxu0  ;;  %2093 = vmatpush3.bf16.msra.mxu1 %v2433_v0 }
 0x10f   : > { %v882_v17 = vadd.f32 %v881_v16, %v811_v15  ;;  %v1946_v18 = vpop.f32.mrb[7].mxu0  ;;  %2100 = vmatprep.subr.bf16.mxu1 %v2241_v4 }
 0x111   : > { %1956 = vmatmul.mubr.msk.f32.vlgmr.msra.gmra.mrb[6].mxu1 %vm321_vm2, %v882_v17 }
 0x112   : > { %2102 = vmatpush3.bf16.msra.mxu1 %v2367_v20  ;;  %1977 = vmatprep.mubr.msk.f32.mxu1 %vm2242_vm1, %v2243_v7 }
 0x113   : > { %2103 = vmatprep.subr.bf16.mxu1 %v2241_v4 }
 0x116   : > { %v1044_v21 = vpop.f32.mrb[8].mxu0  ;;  %2105 = vmatpush3.bf16.msra.mxu1 %v2433_v0 }
 0x117   : > { %v1045_v22 = vadd.f32 %v1044_v21, %v974_v19  ;;  %v1968_v23 = vpop.f32.mrb[9].mxu0  ;;  %2112 = vmatprep.subr.bf16.mxu1 %v2241_v4 }
 0x119   : > { %1978 = vmatmul.mubr.msk.f32.vlgmr.msra.gmra.mrb[8].mxu1 %vm321_vm2, %v1045_v22 }
 0x11a   : > { %2114 = vmatpush3.bf16.msra.mxu1 %v2367_v20  ;;  %1999 = vmatprep.mubr.msk.f32.mxu1 %vm2242_vm1, %v2243_v7 }
 0x11b   : > { %2115 = vmatprep.subr.bf16.mxu1 %v2241_v4 }
 0x11e   : > { %v1207_v25 = vpop.f32.mrb[10].mxu0  ;;  %2117 = vmatpush3.bf16.msra.mxu1 %v2433_v0 }
 0x11f   : > { %v1208_v26 = vadd.f32 %v1207_v25, %v1137_v24  ;;  %v1990_v27 = vpop.f32.mrb[11].mxu0  ;;  %2124 = vmatprep.subr.bf16.mxu1 %v2241_v4 }
 0x121   : > { %2000 = vmatmul.mubr.msk.f32.vlgmr.msra.gmra.mrb[10].mxu1 %vm321_vm2, %v1208_v26 }
 0x122   : > { %2126 = vmatpush3.bf16.msra.mxu1 %v2367_v20  ;;  %2021 = vmatprep.mubr.msk.f32.mxu1 %vm2242_vm1, %v2243_v7 }
 0x123   : > { %2127 = vmatprep.subr.bf16.mxu1 %v2241_v4 }
 0x126   : > { %v1370_v29 = vpop.f32.mrb[12].mxu0  ;;  %2129 = vmatpush3.bf16.msra.mxu1 %v2433_v0 }
 0x127   : > { %v1371_v30 = vadd.f32 %v1370_v29, %v1300_v28  ;;  %v2012_v31 = vpop.f32.mrb[13].mxu0  ;;  %2136 = vmatprep.subr.bf16.mxu1 %v2241_v4 }
 0x129   : > { %2022 = vmatmul.mubr.msk.f32.vlgmr.msra.gmra.mrb[12].mxu1 %vm321_vm2, %v1371_v30 }
 0x12a   : > { %2138 = vmatpush3.bf16.msra.mxu1 %v2367_v20  ;;  %2043 = vmatprep.mubr.msk.f32.mxu1 %vm2242_vm1, %v2243_v7 }
 0x12b   : > { %2139 = vmatprep.subr.bf16.mxu1 %v2241_v4 }
 0x12e   : > { %v1533_v33 = vpop.f32.mrb[14].mxu0  ;;  %2141 = vmatpush3.bf16.msra.mxu1 %v2433_v0 }
 0x12f   : > { %v1534_v34 = vadd.f32 %v1533_v33, %v1463_v32  ;;  %v2034_v35 = vpop.f32.mrb[15].mxu0 }
 0x131   : > { %2044 = vmatmul.mubr.msk.f32.vlgmr.msra.gmra.mrb[14].mxu1 %vm321_vm2, %v1534_v34 }
 0x1cc   : > { %v464_v20 = vpop.f32.mrb[0].mxu1 }
 0x1cd   : > { %v465_v37 = vadd.f32 %v464_v20, %v2499_v36  ;;  %v1891_v7 = vpop.f32.mrb[1].mxu1 }
 0x1cf   : > { %v468_v38 = vmul.f32 %v465_v37, %v465_v37 }
 0x1d1   : > { %v469_v4 = vmul.f32 %v468_v38, %v465_v37 }
 0x1d3   : > { %v470_v39 = vmul.f32 0.044715, %v469_v4 }
 0x1d4   : > { %v628_v40 = vpop.f32.mrb[2].mxu1 }
 0x1d5   : > { %v471_v41 = vadd.f32 %v470_v39, %v465_v37  ;;  %v629_v42 = vadd.f32 %v628_v40, %v2499_v36  ;;  %v1913_v43 = vpop.f32.mrb[3].mxu1 }
 0x1d7   : > { %v472_v44 = vmul.f32 0.7978846, %v471_v41  ;;  %v632_v45 = vmul.f32 %v629_v42, %v629_v42 }
 0x1d9   : > { %2185 = vtanh.f32 %v472_v44  ;;  %v633_v46 = vmul.f32 %v632_v45, %v629_v42 }
 0x1db   : > { %v634_v47 = vmul.f32 0.044715, %v633_v46 }
 0x1dc   : > { %v791_v48 = vpop.f32.mrb[4].mxu1 }
 0x1dd   : > { %v635_v49 = vadd.f32 %v634_v47, %v629_v42  ;;  %v792_v50 = vadd.f32 %v791_v48, %v2499_v36  ;;  %v1935_v51 = vpop.f32.mrb[5].mxu1 }
 0x1df   : > { %v636_v52 = vmul.f32 0.7978846, %v635_v49  ;;  %v795_v53 = vmul.f32 %v792_v50, %v792_v50 }
 0x1e1   : > { %2187 = vtanh.f32 %v636_v52  ;;  %v796_v54 = vmul.f32 %v795_v53, %v792_v50 }
 0x1e3   : > { %v2186_v55 = vpop.eup %2185  ;;  %v797_v56 = vmul.f32 0.044715, %v796_v54 }
 0x1e4   : > { %v474_v57 = vadd.f32 1.0, %v2186_v55  ;;  %v954_v58 = vpop.f32.mrb[6].mxu1 }
 0x1e5   : > { %v798_v59 = vadd.f32 %v797_v56, %v792_v50  ;;  %v955_v60 = vadd.f32 %v954_v58, %v2499_v36  ;;  %v1957_v61 = vpop.f32.mrb[7].mxu1 }
 0x1e6   : > { %v475_v62 = vmul.f32 0.5, %v474_v57 }
 0x1e7   : > { %v799_v63 = vmul.f32 0.7978846, %v798_v59  ;;  %v958_v0 = vmul.f32 %v955_v60, %v955_v60 }
 0x1e8   : > { %v476_v1 = vmul.f32 %v475_v62, %v465_v37 }
 0x1e9   : > { %2189 = vtanh.f32 %v799_v63  ;;  %v959_v2 = vmul.f32 %v958_v0, %v955_v60 }
 0x1ea   : > { %478 = vst.msk [vmem:[%s2338_s30] sm:$0x1] %vm477_vm3, %v476_v1 }
 0x1eb   : > { %v2188_v3 = vpop.eup %2187  ;;  %v960_v5 = vmul.f32 0.044715, %v959_v2 }
 0x1ec   : > { %v638_v6 = vadd.f32 1.0, %v2188_v3  ;;  %v1117_v8 = vpop.f32.mrb[8].mxu1 }
 0x1ed   : > { %v961_v9 = vadd.f32 %v960_v5, %v955_v60  ;;  %v1118_v10 = vadd.f32 %v1117_v8, %v2499_v36  ;;  %v1979_v11 = vpop.f32.mrb[9].mxu1 }
 0x1ee   : > { %v639_v12 = vmul.f32 0.5, %v638_v6 }
 0x1ef   : > { %v962_v13 = vmul.f32 0.7978846, %v961_v9  ;;  %v1121_v14 = vmul.f32 %v1118_v10, %v1118_v10 }
 0x1f0   : > { %v640_v15 = vmul.f32 %v639_v12, %v629_v42 }
 0x1f1   : > { %2191 = vtanh.f32 %v962_v13  ;;  %v1122_v16 = vmul.f32 %v1121_v14, %v1118_v10 }
 0x1f2   : > { %641 = vst.msk [vmem:[%s2338_s30 + $0x1] sm:$0x1] %vm477_vm3, %v640_v15 }
 0x1f3   : > { %v2190_v17 = vpop.eup %2189  ;;  %v1123_v18 = vmul.f32 0.044715, %v1122_v16 }
 0x1f4   : > { %v801_v19 = vadd.f32 1.0, %v2190_v17  ;;  %v1280_v21 = vpop.f32.mrb[10].mxu1 }
 0x1f5   : > { %v1124_v22 = vadd.f32 %v1123_v18, %v1118_v10  ;;  %v1281_v23 = vadd.f32 %v1280_v21, %v2499_v36  ;;  %v2001_v24 = vpop.f32.mrb[11].mxu1 }
 0x1f6   : > { %v802_v25 = vmul.f32 0.5, %v801_v19 }
 0x1f7   : > { %v1125_v26 = vmul.f32 0.7978846, %v1124_v22  ;;  %v1284_v27 = vmul.f32 %v1281_v23, %v1281_v23 }
 0x1f8   : > { %v803_v28 = vmul.f32 %v802_v25, %v792_v50 }
 0x1f9   : > { %2193 = vtanh.f32 %v1125_v26  ;;  %v1285_v29 = vmul.f32 %v1284_v27, %v1281_v23 }
 0x1fa   : > { %804 = vst.msk [vmem:[%s2338_s30 + $0x2] sm:$0x1] %vm477_vm3, %v803_v28 }
 0x1fb   : > { %v2192_v30 = vpop.eup %2191  ;;  %v1286_v31 = vmul.f32 0.044715, %v1285_v29 }
 0x1fc   : > { %v964_v32 = vadd.f32 1.0, %v2192_v30  ;;  %v1443_v33 = vpop.f32.mrb[12].mxu1 }
 0x1fd   : > { %v1287_v34 = vadd.f32 %v1286_v31, %v1281_v23  ;;  %v1444_v35 = vadd.f32 %v1443_v33, %v2499_v36  ;;  %v2023_v20 = vpop.f32.mrb[13].mxu1 }
 0x1fe   : > { %v965_v37 = vmul.f32 0.5, %v964_v32 }
 0x1ff   : > { %v1288_v7 = vmul.f32 0.7978846, %v1287_v34  ;;  %v1447_v38 = vmul.f32 %v1444_v35, %v1444_v35 }
 0x200   : > { %v966_v4 = vmul.f32 %v965_v37, %v955_v60 }
 0x201   : > { %2195 = vtanh.f32 %v1288_v7  ;;  %v1448_v39 = vmul.f32 %v1447_v38, %v1444_v35 }
 0x202   : > { %967 = vst.msk [vmem:[%s2338_s30 + $0x3] sm:$0x1] %vm477_vm3, %v966_v4 }
 0x203   : > { %v2194_v40 = vpop.eup %2193  ;;  %v1449_v41 = vmul.f32 0.044715, %v1448_v39 }
 0x204   : > { %v1127_v42 = vadd.f32 1.0, %v2194_v40  ;;  %v1606_v43 = vpop.f32.mrb[14].mxu1 }
 0x205   : > { %v1450_v44 = vadd.f32 %v1449_v41, %v1444_v35  ;;  %v1607_v45 = vadd.f32 %v1606_v43, %v2499_v36  ;;  %v2045_v46 = vpop.f32.mrb[15].mxu1 }
 0x206   : > { %v1128_v47 = vmul.f32 0.5, %v1127_v42 }
 0x207   : > { %v1451_v48 = vmul.f32 0.7978846, %v1450_v44  ;;  %v1610_v49 = vmul.f32 %v1607_v45, %v1607_v45 }
 0x208   : > { %v1129_v50 = vmul.f32 %v1128_v47, %v1118_v10 }
 0x209   : > { %2197 = vtanh.f32 %v1451_v48  ;;  %v1611_v51 = vmul.f32 %v1610_v49, %v1607_v45 }
 0x20a   : > { %1130 = vst.msk [vmem:[%s2338_s30 + $0x4] sm:$0x1] %vm477_vm3, %v1129_v50 }
 0x20b   : > { %v2196_v52 = vpop.eup %2195  ;;  %v1612_v53 = vmul.f32 0.044715, %v1611_v51 }
 0x20c   : > { %v1290_v54 = vadd.f32 1.0, %v2196_v52 }
 0x20d   : > { %v1613_v55 = vadd.f32 %v1612_v53, %v1607_v45 }
 0x20e   : > { %v1291_v56 = vmul.f32 0.5, %v1290_v54 }
 0x20f   : > { %v1614_v57 = vmul.f32 0.7978846, %v1613_v55 }
 0x210   : > { %v1292_v58 = vmul.f32 %v1291_v56, %v1281_v23 }
 0x211   : > { %2199 = vtanh.f32 %v1614_v57 }
 0x212   : > { %1293 = vst.msk [vmem:[%s2338_s30 + $0x5] sm:$0x1] %vm477_vm3, %v1292_v58 }
 0x213   : > { %v2198_v36 = vpop.eup %2197 }
 0x214   : > { %v1453_v59 = vadd.f32 1.0, %v2198_v36 }
 0x216   : > { %v1454_v60 = vmul.f32 0.5, %v1453_v59 }
 0x218   : > { %v1455_v61 = vmul.f32 %v1454_v60, %v1444_v35 }
 0x21a   : > { %1456 = vst.msk [vmem:[%s2338_s30 + $0x6] sm:$0x1] %vm477_vm3, %v1455_v61 }
 0x21b   : > { %v2200_v62 = vpop.eup %2199 }
 0x21c   : > { %v1616_v63 = vadd.f32 1.0, %v2200_v62 }
 0x21e   : > { %v1617_v0 = vmul.f32 0.5, %v1616_v63 }
 0x220   : > { %v1618_v1 = vmul.f32 %v1617_v0, %v1607_v45 }
 0x222   : > { %1619 = vst.msk [vmem:[%s2338_s30 + $0x7] sm:$0x1] %vm477_vm3, %v1618_v1 }
 0x223 PF: > { %s15_s22 = sadd.s32 1, %s2239_s22   ;;  %s2546_s18 = smov %s2231_s20 }
 0x224   : > { %p12_p8 = scmp.ge.s32.totalorder %s15_s22, 6   ;;  %s2547_s19 = smov %s2235_s21 }
 0x225   : > { %s2548_s20 = smov %s2551_s23  ;;  %s2549_s21 = smov %s2555_s24 }
 0x226   :  { %14 = sbr.rel (!%p12_p8) target bundleno = 3 (0x3), region = 93 }

// kernel: spherical_fno_forward.6
= control target key start
LH: loop header
LB: loop body
LE: loop exit
PB: predicated region body
PF: predicated region fallthrough
CT: control target
= control target key end

     0   :  { %vm18_vm0 = vcmask 261120   ;;  %v353_v0 = vmov 0.0|0.0   ;;  %v354_v4 = vmov 0.0   ;;  %vm355_vm1 = vmmov 0   ;;  %s510_s1 = inlined_call_operand.vmem [shape: f32[32,32], index: 1, kind: input, shape index: {}]   ;;  %s511_s0 = inlined_call_operand.vmem [shape: f32[56,32], index: 0, kind: input, shape index: {}]   ;;  %s512_s2 = inlined_call_operand.vmem [shape: f32[1,32], index: 2, kind: input, shape index: {}]   ;;  %s513_s3 = inlined_call_operand.vmem [shape: f32[56,32], index: 3, kind: output, shape index: {}]  }
   0x1   :  { %326 = vmatprep.subr.bf16.mxu0 %v353_v0  ;;  %332 = vmatprep.subr.bf16.mxu1 %v353_v0  ;;  %v40_v1 = vld [vmem:[%s510_s1] sm:$0xff]  ;;  %v41_v2 = vld [vmem:[%s510_s1 + $0x8] sm:$0xff]  ;;  %v42_v3 = vld [vmem:[%s510_s1 + $0x10] sm:$0xff]  ;;  %19 = vst.msk [vmem:[#allocation2] sm:$0xff] %vm18_vm0, %v354_v4 }
   0x2   :  { %20 = vst.msk [vmem:[#allocation2 + $0x8] sm:$0xff] %vm18_vm0, %v354_v4  ;;  %21 = vst.msk [vmem:[#allocation2 + $0x10] sm:$0xff] %vm18_vm0, %v354_v4  ;;  %v327_v5 = vpack.c.bf16 %v41_v2, %v40_v1  ;;  %v43_v6 = vld [vmem:[%s510_s1 + $0x18] sm:$0xff]  ;;  %305 = vmatprep.mubr.msk.f32.mxu0 %vm355_vm1, %v354_v4  ;;  %317 = vmatprep.mubr.msk.f32.mxu1 %vm355_vm1, %v354_v4  ;;  %v33_v8 = vld [vmem:[%s511_s0] sm:$0xff] }
   0x3   :  { %22 = vst.msk [vmem:[#allocation2 + $0x18] sm:$0xff] %vm18_vm0, %v354_v4  ;;  %23 = vst.msk [vmem:[#allocation2 + $0x20] sm:$0xff] %vm18_vm0, %v354_v4  ;;  %v330_v7 = vpack.c.bf16 %v43_v6, %v42_v3  ;;  %v37_v9 = vld [vmem:[%s511_s0 + $0x20] sm:$0xff]  ;;  %v34_v10 = vld [vmem:[%s511_s0 + $0x8] sm:$0xff] }
   0x4   :  { %24 = vst.msk [vmem:[#allocation2 + $0x28] sm:$0xff] %vm18_vm0, %v354_v4  ;;  %25 = vst.msk [vmem:[#allocation2 + $0x30] sm:$0xff] %vm18_vm0, %v354_v4  ;;  %328 = vmatpush3.bf16.msra.mxu0 %v327_v5  ;;  %334 = vmatpush3.bf16.msra.mxu1 %v327_v5  ;;  %v38_v11 = vld [vmem:[%s511_s0 + $0x28] sm:$0xff]  ;;  %v35_v12 = vld [vmem:[%s511_s0 + $0x10] sm:$0xff] }
   0x5   :  { %329 = vmatprep.subr.bf16.mxu0 %v353_v0  ;;  %333 = vmatprep.subr.bf16.mxu1 %v353_v0  ;;  %v39_v13 = vld [vmem:[%s511_s0 + $0x30] sm:$0xff]  ;;  %v36_v14 = vld [vmem:[%s511_s0 + $0x18] sm:$0xff]  ;;  %v285_v33 = vld [vmem:[%s512_s2] ss:$0 sm:$0xff] }
   0x8   :  { %331 = vmatpush3.bf16.msra.mxu0 %v330_v7  ;;  %335 = vmatpush3.bf16.msra.mxu1 %v330_v7  ;;  %v26_v15 = vld [vmem:[#allocation2] sm:$0xff] }
   0x9   :  { %v27_v23 = vld [vmem:[#allocation2 + $0x8] sm:$0xff]  ;;  %v28_v31 = vld [vmem:[#allocation2 + $0x10] sm:$0xff] }
   0xa   :  { %v30_v16 = vld [vmem:[#allocation2 + $0x20] sm:$0xff]  ;;  %v29_v42 = vld [vmem:[#allocation2 + $0x18] sm:$0xff] }
   0xb   :  { %306 = vmatmul.mubr.msk.f32.vlgmr.msra.gmra.mrb[0].mxu0 %vm18_vm0, %v33_v8  ;;  %318 = vmatmul.mubr.msk.f32.vlgmr.msra.gmra.mrb[0].mxu1 %vm18_vm0, %v37_v9  ;;  %v31_v24 = vld [vmem:[#allocation2 + $0x28] sm:$0xff]  ;;  %v32_v32 = vld [vmem:[#allocation2 + $0x30] sm:$0xff] }
   0xc   :  { %308 = vmatprep.mubr.msk.f32.mxu0 %vm355_vm1, %v354_v4  ;;  %320 = vmatprep.mubr.msk.f32.mxu1 %vm355_vm1, %v354_v4 }
   0xf   :  { %309 = vmatmul.mubr.msk.f32.gmra.mrb[2].mxu0 %vm18_vm0, %v34_v10  ;;  %321 = vmatmul.mubr.msk.f32.gmra.mrb[2].mxu1 %vm18_vm0, %v38_v11 }
  0x10   :  { %311 = vmatprep.mubr.msk.f32.mxu0 %vm355_vm1, %v354_v4  ;;  %323 = vmatprep.mubr.msk.f32.mxu1 %vm355_vm1, %v354_v4 }
  0x13   :  { %312 = vmatmul.mubr.msk.f32.gmra.mrb[4].mxu0 %vm18_vm0, %v35_v12  ;;  %324 = vmatmul.mubr.msk.f32.gmra.mrb[4].mxu1 %vm18_vm0, %v39_v13 }
  0x14   :  { %314 = vmatprep.mubr.msk.f32.mxu0 %vm355_vm1, %v354_v4 }
  0x17   :  { %315 = vmatmul.mubr.msk.f32.gmra.mrb[6].mxu0 %vm18_vm0, %v36_v14 }
  0xde   :  { %v132_v17 = vpop.f32.mrb[0].mxu0  ;;  %v152_v18 = vpop.f32.mrb[0].mxu1 }
  0xdf   :  { %v166_v19 = vadd.f32 %v132_v17, %v26_v15  ;;  %v170_v20 = vadd.f32 %v152_v18, %v30_v16  ;;  %v307_v21 = vpop.f32.mrb[1].mxu0  ;;  %v319_v22 = vpop.f32.mrb[1].mxu1 }
  0xe1   :  { %173 = vst.msk [vmem:[#allocation2] sm:$0xff] %vm18_vm0, %v166_v19  ;;  %177 = vst.msk [vmem:[#allocation2 + $0x20] sm:$0xff] %vm18_vm0, %v170_v20 }
  0xe2   :  { %v137_v25 = vpop.f32.mrb[2].mxu0  ;;  %v157_v26 = vpop.f32.mrb[2].mxu1 }
  0xe3   :  { %v167_v27 = vadd.f32 %v137_v25, %v27_v23  ;;  %v171_v28 = vadd.f32 %v157_v26, %v31_v24  ;;  %v310_v29 = vpop.f32.mrb[3].mxu0  ;;  %v322_v30 = vpop.f32.mrb[3].mxu1 }
  0xe5   :  { %174 = vst.msk [vmem:[#allocation2 + $0x8] sm:$0xff] %vm18_vm0, %v167_v27  ;;  %178 = vst.msk [vmem:[#allocation2 + $0x28] sm:$0xff] %vm18_vm0, %v171_v28 }
  0xe6   :  { %v142_v34 = vpop.f32.mrb[4].mxu0  ;;  %v162_v35 = vpop.f32.mrb[4].mxu1 }
  0xe7   :  { %v168_v36 = vadd.f32 %v142_v34, %v28_v31  ;;  %v172_v37 = vadd.f32 %v162_v35, %v32_v32  ;;  %v313_v38 = vpop.f32.mrb[5].mxu0  ;;  %v325_v39 = vpop.f32.mrb[5].mxu1 }
  0xe8   :  { %v183_v40 = vld [vmem:[#allocation2] sm:$0xff] }
  0xe9   :  { %v187_v41 = vld [vmem:[#allocation2 + $0x20] sm:$0xff]  ;;  %v437_v43 = vadd.f32 %v285_v33, %v183_v40  ;;  %175 = vst.msk [vmem:[#allocation2 + $0x10] sm:$0xff] %vm18_vm0, %v168_v36  ;;  %179 = vst.msk [vmem:[#allocation2 + $0x30] sm:$0xff] %vm18_vm0, %v172_v37 }
  0xea   :  { %v439_v44 = vadd.f32 %v285_v33, %v187_v41  ;;  %v147_v45 = vpop.f32.mrb[6].mxu0 }
  0xeb   :  { %v204_v46 = vmul.f32 %v437_v43, %v437_v43  ;;  %v169_v48 = vadd.f32 %v147_v45, %v29_v42  ;;  %v316_v49 = vpop.f32.mrb[7].mxu0 }
  0xec   :  { %v208_v47 = vmul.f32 %v439_v44, %v439_v44  ;;  %v184_v50 = vld [vmem:[#allocation2 + $0x8] sm:$0xff] }
  0xed   :  { %v188_v51 = vld [vmem:[#allocation2 + $0x28] sm:$0xff]  ;;  %v211_v52 = vmul.f32 %v204_v46, %v437_v43  ;;  %v449_v54 = vadd.f32 %v285_v33, %v184_v50  ;;  %176 = vst.msk [vmem:[#allocation2 + $0x18] sm:$0xff] %vm18_vm0, %v169_v48 }
  0xee   :  { %v215_v53 = vmul.f32 %v208_v47, %v439_v44  ;;  %v451_v55 = vadd.f32 %v285_v33, %v188_v51 }
  0xef   :  { %v218_v56 = vmul.f32 0.044715, %v211_v52  ;;  %v205_v58 = vmul.f32 %v449_v54, %v449_v54 }
  0xf0   :  { %v222_v57 = vmul.f32 0.044715, %v215_v53  ;;  %v209_v59 = vmul.f32 %v451_v55, %v451_v55  ;;  %v185_v60 = vld [vmem:[#allocation2 + $0x10] sm:$0xff] }
  0xf1   :  { %v189_v61 = vld [vmem:[#allocation2 + $0x30] sm:$0xff]  ;;  %v225_v62 = vadd.f32 %v218_v56, %v437_v43  ;;  %v212_v0 = vmul.f32 %v205_v58, %v449_v54  ;;  %v462_v2 = vadd.f32 %v285_v33, %v185_v60 }
  0xf2   :  { %v229_v63 = vadd.f32 %v222_v57, %v439_v44  ;;  %v216_v1 = vmul.f32 %v209_v59, %v451_v55  ;;  %v464_v3 = vadd.f32 %v285_v33, %v189_v61 }
  0xf3   :  { %v232_v4 = vmul.f32 0.7978846, %v225_v62  ;;  %v219_v6 = vmul.f32 0.044715, %v212_v0  ;;  %v206_v8 = vmul.f32 %v462_v2, %v462_v2 }
  0xf4   :  { %v236_v5 = vmul.f32 0.7978846, %v229_v63  ;;  %v223_v7 = vmul.f32 0.044715, %v216_v1  ;;  %v210_v9 = vmul.f32 %v464_v3, %v464_v3  ;;  %v186_v10 = vld [vmem:[#allocation2 + $0x18] sm:$0xff] }
  0xf5   :  { %339 = vtanh.f32 %v232_v4  ;;  %v226_v11 = vadd.f32 %v219_v6, %v449_v54  ;;  %v200_v12 = vadd.f32 %v285_v33, %v186_v10  ;;  %v213_v14 = vmul.f32 %v206_v8, %v462_v2 }
  0xf6   :  { %341 = vtanh.f32 %v236_v5  ;;  %v230_v13 = vadd.f32 %v223_v7, %v451_v55  ;;  %v217_v15 = vmul.f32 %v210_v9, %v464_v3 }
  0xf7   :  { %v233_v16 = vmul.f32 0.7978846, %v226_v11  ;;  %v207_v17 = vmul.f32 %v200_v12, %v200_v12  ;;  %v220_v19 = vmul.f32 0.044715, %v213_v14 }
  0xf8   :  { %v237_v18 = vmul.f32 0.7978846, %v230_v13  ;;  %v224_v20 = vmul.f32 0.044715, %v217_v15 }
  0xf9   :  { %343 = vtanh.f32 %v233_v16  ;;  %v214_v21 = vmul.f32 %v207_v17, %v200_v12  ;;  %v227_v22 = vadd.f32 %v220_v19, %v462_v2 }
  0xfa   :  { %345 = vtanh.f32 %v237_v18  ;;  %v231_v23 = vadd.f32 %v224_v20, %v464_v3 }
  0xfb   :  { %v221_v24 = vmul.f32 0.044715, %v214_v21  ;;  %v234_v25 = vmul.f32 0.7978846, %v227_v22 }
  0xfc   :  { %v238_v26 = vmul.f32 0.7978846, %v231_v23 }
  0xfd   :  { %v228_v27 = vadd.f32 %v221_v24, %v200_v12  ;;  %347 = vtanh.f32 %v234_v25 }
  0xfe   :  { %349 = vtanh.f32 %v238_v26 }
  0xff   :  { %v340_v28 = vpop.eup %339  ;;  %v235_v29 = vmul.f32 0.7978846, %v228_v27 }
 0x100   :  { %v342_v30 = vpop.eup %341  ;;  %v246_v31 = vadd.f32 1.0, %v340_v28 }
 0x101   :  { %v250_v32 = vadd.f32 1.0, %v342_v30  ;;  %351 = vtanh.f32 %v235_v29 }
 0x102   :  { %v253_v33 = vmul.f32 0.5, %v246_v31 }
 0x103   :  { %v344_v34 = vpop.eup %343  ;;  %v257_v35 = vmul.f32 0.5, %v250_v32 }
 0x104   :  { %v346_v36 = vpop.eup %345  ;;  %v260_v37 = vmul.f32 %v253_v33, %v437_v43  ;;  %v247_v38 = vadd.f32 1.0, %v344_v34 }
 0x105   :  { %v264_v39 = vmul.f32 %v257_v35, %v439_v44  ;;  %v251_v40 = vadd.f32 1.0, %v346_v36 }
 0x106   :  { %267 = vst.msk [vmem:[%s513_s3] sm:$0xff] %vm18_vm0, %v260_v37  ;;  %v254_v41 = vmul.f32 0.5, %v247_v38 }
 0x107   :  { %271 = vst.msk [vmem:[%s513_s3 + $0x20] sm:$0xff] %vm18_vm0, %v264_v39  ;;  %v258_v42 = vmul.f32 0.5, %v251_v40  ;;  %v348_v45 = vpop.eup %347 }
 0x108   :  { %v261_v46 = vmul.f32 %v254_v41, %v449_v54  ;;  %v350_v43 = vpop.eup %349  ;;  %v248_v44 = vadd.f32 1.0, %v348_v45 }
 0x109   :  { %v265_v47 = vmul.f32 %v258_v42, %v451_v55  ;;  %v252_v48 = vadd.f32 1.0, %v350_v43 }
 0x10a   :  { %268 = vst.msk [vmem:[%s513_s3 + $0x8] sm:$0xff] %vm18_vm0, %v261_v46  ;;  %v255_v50 = vmul.f32 0.5, %v248_v44 }
 0x10b   :  { %v352_v49 = vpop.eup %351  ;;  %272 = vst.msk [vmem:[%s513_s3 + $0x28] sm:$0xff] %vm18_vm0, %v265_v47  ;;  %v259_v51 = vmul.f32 0.5, %v252_v48 }
 0x10c   :  { %v249_v52 = vadd.f32 1.0, %v352_v49  ;;  %v262_v53 = vmul.f32 %v255_v50, %v462_v2 }
 0x10d   :  { %v266_v54 = vmul.f32 %v259_v51, %v464_v3 }
 0x10e   :  { %v256_v55 = vmul.f32 0.5, %v249_v52  ;;  %269 = vst.msk [vmem:[%s513_s3 + $0x10] sm:$0xff] %vm18_vm0, %v262_v53 }
 0x10f   :  { %273 = vst.msk [vmem:[%s513_s3 + $0x30] sm:$0xff] %vm18_vm0, %v266_v54 }
 0x110   :  { %v263_v56 = vmul.f32 %v256_v55, %v200_v12 }
 0x112   :  { %270 = vst.msk [vmem:[%s513_s3 + $0x18] sm:$0xff] %vm18_vm0, %v263_v56 }

// kernel: spherical_fno_forward.7
= control target key start
LH: loop header
LB: loop body
LE: loop exit
PB: predicated region body
PF: predicated region fallthrough
CT: control target
= control target key end

     0   :  { %s1893_s21 = smov 0   ;;  %s1895_s22 = smov 0   ;;  %s2338_s0 = inlined_call_operand.vmem [shape: f32[2,8,32], index: 0, kind: input, shape index: {}]   ;;  %s2339_s1 = inlined_call_operand.vmem [shape: f32[56,32], index: 1, kind: input, shape index: {}]   ;;  %s2340_s2 = inlined_call_operand.vmem [shape: f32[256,8], index: 2, kind: input, shape index: {}]   ;;  %s2341_s3 = inlined_call_operand.vmem [shape: f32[256,56], index: 3, kind: input, shape index: {}]   ;;  %s2342_s4 = inlined_call_operand.vmem [shape: f32[32,3], index: 4, kind: input, shape index: {}]   ;;  %s2343_s5 = inlined_call_operand.vmem [shape: f32[1,3], index: 5, kind: input, shape index: {}]   ;;  %s2344_s6 = inlined_call_operand.vmem [shape: f32[2,256,3], index: 6, kind: output, shape index: {}]  }
   0x1   :  { %s1897_s23 = smov 0  }
   0x2 LB: > { %s28_s24 = sadd.s32 1, %s1849_s22  ;;  %p1420_p0 = scmp.ge.s32.totalorder %s1853_s23, 1  ;;  %s1853_s23 = sphi %s1897_s23, %s16_s23   ;;  %s1849_s22 = sphi %s1895_s22, %s2346_s22   ;;  %s1845_s21 = sphi %s1893_s21, %s2345_s21  }
   0x3   : > { %p30_p1 = scmp.ge.s32.totalorder %s28_s24, 2  ;;  %p247_p2 = scmp.lt.s32.totalorder %s1853_s23, 3 }
   0x5   : > { %s2348_s24 = smov (%p30_p1, %s28_s24), 0  ;;  %p248_p3 = pnand %p1420_p0, %p247_p2 }
   0x6   : > { %v316_v0 = vld [vmem:[%s2342_s4] sm:$0xff] (!%p248_p3)  ;;  %v317_v1 = vld [vmem:[%s2342_s4 + $0x8] sm:$0xff] (!%p248_p3)  ;;  %v318_v2 = vld [vmem:[%s2342_s4 + $0x10] sm:$0xff] (!%p248_p3)  ;;  %v1855_v3 = vmov (!%p248_p3), 0.0|0.0   ;;  %vm1856_vm0 = vmmov (!%p248_p3), 0   ;;  %v1857_v6 = vmov (!%p248_p3), 0.0  }
   0x7   : > { %251 = sbr.rel (%p248_p3) target bundleno = 542 (0x21e), region = 44  ;;  %1746 = vmatprep.subr.bf16.mxu1 (!%p248_p3), %v1855_v3  ;;  %v1741_v4 = vpack.c.bf16 (!%p248_p3), %v317_v1, %v316_v0  ;;  %v319_v5 = vld [vmem:[%s2342_s4 + $0x18] sm:$0xff] (!%p248_p3)  ;;  %1607 = vmatprep.mubr.msk.f32.mxu1 (!%p248_p3), %vm1856_vm0, %v1857_v6  ;;  %p290_p4 = scmp.lt.s32.totalorder (!%p248_p3), %s1845_s21, 1  ;;  %vm321_vm1 = vcmask (!%p248_p3), 261120   ;;  %v395_v8 = vld [vmem:[%s2339_s1] sm:$0xff] (!%p248_p3)  ;;  %v396_v10 = vld [vmem:[%s2339_s1 + $0x8] sm:$0xff] (!%p248_p3) }
   0x8   : > { %1740 = vmatprep.subr.bf16.mxu0 (!%p248_p3), %v1855_v3  ;;  %1596 = vmatprep.mubr.msk.f32.mxu0 (!%p248_p3), %vm1856_vm0, %v1857_v6  ;;  %v1744_v7 = vpack.c.bf16 (!%p248_p3), %v319_v5, %v318_v2  ;;  %v397_v11 = vld [vmem:[%s2339_s1 + $0x10] sm:$0xff] (!%p248_p3)  ;;  %v398_v12 = vld [vmem:[%s2339_s1 + $0x18] sm:$0xff] (!%p248_p3)  ;;  %v399_v13 = vld [vmem:[%s2339_s1 + $0x20] sm:$0xff] (!%p248_p3)  ;;  %vm587_vm2 = vcmask (!%p248_p3), 457728   ;;  %vm909_vm3 = vcmask (!%p248_p3), 64512   ;;  %vm1270_vm4 = vcmask (!%p248_p3), 23552  }
   0x9   : > { %1748 = vmatpush3.bf16.msra.mxu1 (!%p248_p3), %v1741_v4  ;;  %1742 = vmatpush3.bf16.msra.mxu0 (!%p248_p3), %v1741_v4  ;;  %v400_v14 = vld [vmem:[%s2339_s1 + $0x28] sm:$0xff] (!%p248_p3)  ;;  %v401_v15 = vld [vmem:[%s2339_s1 + $0x30] sm:$0xff] (!%p248_p3)  ;;  %v555_v16 = vld [vmem:[%s2341_s3] sm:$0xff] (!%p248_p3) }
   0xa   : > { %1749 = vmatprep.subr.bf16.mxu1 (!%p248_p3), %v1855_v3  ;;  %1743 = vmatprep.subr.bf16.mxu0 (!%p248_p3), %v1855_v3  ;;  %v559_v17 = vld [vmem:[%s2341_s3 + $0x20] sm:$0xff] (!%p248_p3)  ;;  %v556_v37 = vld [vmem:[%s2341_s3 + $0x8] sm:$0xff] (!%p248_p3)  ;;  %v557_v38 = vld [vmem:[%s2341_s3 + $0x10] sm:$0xff] (!%p248_p3) }
   0xb   : > { %v560_v39 = vld [vmem:[%s2341_s3 + $0x28] sm:$0xff] (!%p248_p3)  ;;  %v561_v40 = vld [vmem:[%s2341_s3 + $0x30] sm:$0xff] (!%p248_p3)  ;;  %v558_v41 = vld [vmem:[%s2341_s3 + $0x18] sm:$0xff] (!%p248_p3) }
   0xc   : > { %v523_v42 = vld [vmem:[%s2340_s2] sm:$0xff] (!%p248_p3)  ;;  %v562_v43 = vld [vmem:[%s2341_s3 + $0x38] sm:$0xff] (!%p248_p3)  ;;  %v524_v45 = vld [vmem:[%s2340_s2 + $0x8] sm:$0xff] (!%p248_p3) }
   0xd   : > { %1751 = vmatpush3.bf16.msra.mxu1 (!%p248_p3), %v1744_v7  ;;  %1745 = vmatpush3.bf16.msra.mxu0 (!%p248_p3), %v1744_v7  ;;  %v563_v44 = vld [vmem:[%s2341_s3 + $0x40] sm:$0xff] (!%p248_p3)  ;;  %v525_v46 = vld [vmem:[%s2340_s2 + $0x10] sm:$0xff] (!%p248_p3)  ;;  %v564_v47 = vld [vmem:[%s2341_s3 + $0x48] sm:$0xff] (!%p248_p3) }
   0xe   : > { %s2350_s21 = smov (!%p290_p4, %s1845_s21), 1  ;;  %v565_v48 = vld [vmem:[%s2341_s3 + $0x50] sm:$0xff]  ;;  %v526_v49 = vld [vmem:[%s2340_s2 + $0x18] sm:$0xff]  ;;  %v527_v50 = vld [vmem:[%s2340_s2 + $0x20] sm:$0xff] }
   0xf   : > { %s1421_s9 = sshll.u32 %s2350_s21, 3  ;;  %v566_v51 = vld [vmem:[%s2341_s3 + $0x58] sm:$0xff]  ;;  %v567_v52 = vld [vmem:[%s2341_s3 + $0x60] sm:$0xff]  ;;  %v528_v53 = vld [vmem:[%s2340_s2 + $0x28] sm:$0xff]  ;;  %s1499_s15 = sshll.u32 %s2350_s21, 8 }
  0x10   : > { %s293_s12 = scalar_lea.vmem %s2338_s0, %s1421_s9  ;;  %1608 = vmatmul.mubr.msk.f32.vlgmr.msra.gmra.mrb[0].mxu1 %vm321_vm1, %v395_v8  ;;  %v529_v54 = vld [vmem:[%s2340_s2 + $0x30] sm:$0xff]  ;;  %v568_v55 = vld [vmem:[%s2341_s3 + $0x68] sm:$0xff]  ;;  %v530_v57 = vld [vmem:[%s2340_s2 + $0x38] sm:$0xff]  ;;  %s2231_s20 = scalar_lea.vmem %s2344_s6, %s1499_s15 }
  0x11   : > { %v320_v9 = vld [vmem:[%s293_s12] sm:$0xff]  ;;  %1610 = vmatprep.mubr.msk.f32.mxu1 %vm1856_vm0, %v1857_v6  ;;  %v569_v56 = vld [vmem:[%s2341_s3 + $0x70] sm:$0xff]  ;;  %v570_v59 = vld [vmem:[%s2341_s3 + $0x78] sm:$0xff] }
  0x12   : > { %1597 = vmatmul.mubr.msk.f32.vlgmr.msra.gmra.mrb[0].mxu0 %vm321_vm1, %v320_v9  ;;  %v531_v58 = vld [vmem:[%s2340_s2 + $0x40] sm:$0xff]  ;;  %v532_v61 = vld [vmem:[%s2340_s2 + $0x48] sm:$0xff]  ;;  %v533_v62 = vld [vmem:[%s2340_s2 + $0x50] sm:$0xff] }
  0x13   : > { %1642 = vmatprep.mubr.msk.f32.mxu0 %vm587_vm2, %v555_v16  ;;  %v571_v60 = vld [vmem:[%s2341_s3 + $0x80] sm:$0xff]  ;;  %v572_v63 = vld [vmem:[%s2341_s3 + $0x88] sm:$0xff]  ;;  %v573_v0 = vld [vmem:[%s2341_s3 + $0x90] sm:$0xff] }
  0x14   : > { %1611 = vmatmul.mubr.msk.f32.gmra.mrb[2].mxu1 %vm321_vm1, %v396_v10  ;;  %v534_v1 = vld [vmem:[%s2340_s2 + $0x58] sm:$0xff]  ;;  %v535_v2 = vld [vmem:[%s2340_s2 + $0x60] sm:$0xff]  ;;  %v536_v5 = vld [vmem:[%s2340_s2 + $0x68] sm:$0xff] }
  0x15   : > { %1613 = vmatprep.mubr.msk.f32.mxu1 %vm1856_vm0, %v1857_v6  ;;  %v574_v3 = vld [vmem:[%s2341_s3 + $0x98] sm:$0xff]  ;;  %v575_v4 = vld [vmem:[%s2341_s3 + $0xa0] sm:$0xff]  ;;  %v576_v7 = vld [vmem:[%s2341_s3 + $0xa8] sm:$0xff] }
  0x16   : > { %v577_v8 = vld [vmem:[%s2341_s3 + $0xb0] sm:$0xff]  ;;  %v538_v9 = vld [vmem:[%s2340_s2 + $0x78] sm:$0xff]  ;;  %v539_v10 = vld [vmem:[%s2340_s2 + $0x80] sm:$0xff] }
  0x17   : > { %v581_v16 = vld [vmem:[%s2341_s3 + $0xd0] sm:$0xff] }
  0x18   : > { %1614 = vmatmul.mubr.msk.f32.gmra.mrb[4].mxu1 %vm321_vm1, %v397_v11  ;;  %v578_v11 = vld [vmem:[%s2341_s3 + $0xb8] sm:$0xff] }
  0x19   : > { %1616 = vmatprep.mubr.msk.f32.mxu1 %vm1856_vm0, %v1857_v6 }
  0x1c   : > { %1617 = vmatmul.mubr.msk.f32.gmra.mrb[6].mxu1 %vm321_vm1, %v398_v12  ;;  %v579_v12 = vld [vmem:[%s2341_s3 + $0xc0] sm:$0xff] }
  0x1d   : > { %1619 = vmatprep.mubr.msk.f32.mxu1 %vm1856_vm0, %v1857_v6 }
  0x20   : > { %1620 = vmatmul.mubr.msk.f32.gmra.mrb[8].mxu1 %vm321_vm1, %v399_v13  ;;  %v540_v13 = vld [vmem:[%s2340_s2 + $0x88] sm:$0xff] }
  0x21   : > { %1622 = vmatprep.mubr.msk.f32.mxu1 %vm1856_vm0, %v1857_v6 }
  0x24   : > { %1623 = vmatmul.mubr.msk.f32.gmra.mrb[10].mxu1 %vm321_vm1, %v400_v14  ;;  %v541_v14 = vld [vmem:[%s2340_s2 + $0x90] sm:$0xff] }
  0x25   : > { %1625 = vmatprep.mubr.msk.f32.mxu1 %vm1856_vm0, %v1857_v6  ;;  %v537_v6 = vld [vmem:[%s2340_s2 + $0x70] sm:$0xff] }
  0x28   : > { %1626 = vmatmul.mubr.msk.f32.gmra.mrb[12].mxu1 %vm321_vm1, %v401_v15  ;;  %v580_v15 = vld [vmem:[%s2341_s3 + $0xc8] sm:$0xff] }
  0x29   : > { %1648 = vmatprep.mubr.msk.f32.mxu1 %vm587_vm2, %v559_v17  ;;  %v542_v17 = vld [vmem:[%s2340_s2 + $0x98] sm:$0xff] }
  0xe3   : > { %v489_v18 = vpop.f32.mrb[0].mxu1 }
  0xe4   : > { %v1609_v20 = vpop.f32.mrb[1].mxu1 }
  0xe5   : > { %v391_v19 = vpop.f32.mrb[0].mxu0  ;;  %v583_v20 = vld [vmem:[%s2341_s3 + $0xe0] sm:$0xff] }
  0xe6   : > { %v1598_v21 = vpop.f32.mrb[1].mxu0 }
  0xe7   : > { %v494_v22 = vpop.f32.mrb[2].mxu1  ;;  %v544_v21 = vld [vmem:[%s2340_s2 + $0xa8] sm:$0xff] }
  0xe8   : > { %v1752_v23 = vpack.c.bf16 %v494_v22, %v489_v18  ;;  %v1612_v24 = vpop.f32.mrb[3].mxu1  ;;  %v543_v18 = vld [vmem:[%s2340_s2 + $0xa0] sm:$0xff]  ;;  %v545_v22 = vld [vmem:[%s2340_s2 + $0xb0] sm:$0xff] }
  0xe9   : > { %v585_v24 = vld [vmem:[%s2341_s3 + $0xf0] sm:$0xff] }
  0xea   : > { %1753 = vmatprep.subr.bf16.mxu0 %v1752_v23  ;;  %1764 = vmatprep.subr.bf16.mxu1 %v1752_v23 }
  0xeb   : > { %v499_v25 = vpop.f32.mrb[4].mxu1  ;;  %1755 = vmatpush3.bf16.msra.mxu0 %v1752_v23  ;;  %1768 = vmatpush3.bf16.msra.mxu1 %v1752_v23  ;;  %v584_v23 = vld [vmem:[%s2341_s3 + $0xe8] sm:$0xff] }
  0xec   : > { %v1615_v26 = vpop.f32.mrb[5].mxu1 }
  0xed   : > { %v547_v26 = vld [vmem:[%s2340_s2 + $0xc0] sm:$0xff] }
  0xef   : > { %v504_v27 = vpop.f32.mrb[6].mxu1 }
  0xf0   : > { %v1756_v28 = vpack.c.bf16 %v504_v27, %v499_v25  ;;  %v1618_v29 = vpop.f32.mrb[7].mxu1  ;;  %v546_v25 = vld [vmem:[%s2340_s2 + $0xb8] sm:$0xff] }
  0xf1   : > { %v586_v27 = vld [vmem:[%s2341_s3 + $0xf8] sm:$0xff]  ;;  %v549_v29 = vld [vmem:[%s2340_s2 + $0xd0] sm:$0xff] }
  0xf2   : > { %1757 = vmatprep.subr.bf16.mxu0 %v1756_v28  ;;  %1765 = vmatprep.subr.bf16.mxu1 %v1756_v28 }
  0xf3   : > { %v509_v30 = vpop.f32.mrb[8].mxu1  ;;  %1759 = vmatpush3.bf16.msra.mxu0 %v1756_v28  ;;  %1769 = vmatpush3.bf16.msra.mxu1 %v1756_v28  ;;  %v548_v28 = vld [vmem:[%s2340_s2 + $0xc8] sm:$0xff] }
  0xf4   : > { %v1621_v31 = vpop.f32.mrb[9].mxu1 }
  0xf5   : > { %v551_v31 = vld [vmem:[%s2340_s2 + $0xe0] sm:$0xff] }
  0xf7   : > { %v514_v32 = vpop.f32.mrb[10].mxu1 }
  0xf8   : > { %v1760_v33 = vpack.c.bf16 %v514_v32, %v509_v30  ;;  %v1624_v34 = vpop.f32.mrb[11].mxu1  ;;  %v550_v30 = vld [vmem:[%s2340_s2 + $0xd8] sm:$0xff]  ;;  %v552_v32 = vld [vmem:[%s2340_s2 + $0xe8] sm:$0xff] }
  0xf9   : > { %v554_v34 = vld [vmem:[%s2340_s2 + $0xf8] sm:$0xff] }
  0xfa   : > { %1761 = vmatprep.subr.bf16.mxu0 %v1760_v33  ;;  %1766 = vmatprep.subr.bf16.mxu1 %v1760_v33 }
  0xfb   : > { %1763 = vmatpush3.bf16.msra.mxu0 %v1760_v33  ;;  %1770 = vmatpush3.bf16.msra.mxu1 %v1760_v33  ;;  %v519_v35 = vpop.f32.mrb[12].mxu1  ;;  %v553_v33 = vld [vmem:[%s2340_s2 + $0xf0] sm:$0xff] }
  0xfc   : > { %v1627_v36 = vpop.f32.mrb[13].mxu1  ;;  %1640 = vmatprep.subr.mxu0 %v519_v35  ;;  %1767 = vmatprep.subr.mxu1 %v519_v35 }
  0xff   : > { %1641 = vmatpush3.msra.mxu0 %v519_v35  ;;  %1771 = vmatpush3.msra.mxu1 %v519_v35 }
 0x100   : > { %1643 = vmatmul.mubr.msk.f32.vlgmr.msra.gmra.mrb[2].mxu0 %vm587_vm2, %v556_v37  ;;  %1690 = vmatprep.subr.mxu0 %v391_v19  ;;  %v2226_v37 = vld [vmem:[%s2343_s5] ss:$0 sm:$0xff] }
 0x101   : > { %1691 = vmatpush3.msra.mxu0 %v391_v19  ;;  %1645 = vmatprep.mubr.msk.f32.mxu0 %vm587_vm2, %v557_v38  ;;  %v582_v19 = vld [vmem:[%s2341_s3 + $0xd8] sm:$0xff] }
 0x102   : > { %1649 = vmatmul.mubr.msk.f32.vlgmr.msra.gmra.mrb[14].mxu1 %vm587_vm2, %v560_v39 }
 0x103   : > { %1651 = vmatprep.mubr.msk.f32.mxu1 %vm587_vm2, %v561_v40 }
 0x104   : > { %1646 = vmatmul.mubr.msk.f32.gmra.mrb[4].mxu0 %vm587_vm2, %v558_v41 }
 0x105   : > { %1692 = vmatprep.mubr.msk.f32.mxu0 %vm909_vm3, %v523_v42 }
 0x106   : > { %1652 = vmatmul.mubr.msk.f32.gmra.mrb[16].mxu1 %vm587_vm2, %v562_v43 }
 0x107   : > { %1654 = vmatprep.mubr.msk.f32.mxu1 %vm587_vm2, %v563_v44 }
 0x108   : > { %1693 = vmatmul.mubr.msk.f32.vlgmr.msra.gmra.mrb[2].mxu0 %vm909_vm3, %v524_v45 }
 0x109   : > { %1695 = vmatprep.mubr.msk.f32.mxu0 %vm909_vm3, %v525_v46 }
 0x10a   : > { %1655 = vmatmul.mubr.msk.f32.gmra.mrb[18].mxu1 %vm587_vm2, %v564_v47 }
 0x10b   : > { %1657 = vmatprep.mubr.msk.f32.mxu1 %vm587_vm2, %v565_v48 }
 0x10c   : > { %1696 = vmatmul.mubr.msk.f32.gmra.mrb[4].mxu0 %vm909_vm3, %v526_v49 }
 0x10d   : > { %1698 = vmatprep.mubr.msk.f32.mxu0 %vm909_vm3, %v527_v50 }
 0x10e   : > { %1658 = vmatmul.mubr.msk.f32.gmra.mrb[20].mxu1 %vm587_vm2, %v566_v51 }
 0x10f   : > { %1660 = vmatprep.mubr.msk.f32.mxu1 %vm587_vm2, %v567_v52 }
 0x110   : > { %1699 = vmatmul.mubr.msk.f32.gmra.mrb[6].mxu0 %vm909_vm3, %v528_v53 }
 0x111   : > { %1701 = vmatprep.mubr.msk.f32.mxu0 %vm909_vm3, %v529_v54 }
 0x112   : > { %1661 = vmatmul.mubr.msk.f32.gmra.mrb[22].mxu1 %vm587_vm2, %v568_v55 }
 0x113   : > { %1663 = vmatprep.mubr.msk.f32.mxu1 %vm587_vm2, %v569_v56 }
 0x114   : > { %1702 = vmatmul.mubr.msk.f32.gmra.mrb[8].mxu0 %vm909_vm3, %v530_v57 }
 0x115   : > { %1704 = vmatprep.mubr.msk.f32.mxu0 %vm909_vm3, %v531_v58 }
 0x116   : > { %1664 = vmatmul.mubr.msk.f32.gmra.mrb[24].mxu1 %vm587_vm2, %v570_v59 }
 0x117   : > { %1666 = vmatprep.mubr.msk.f32.mxu1 %vm587_vm2, %v571_v60 }
 0x118   : > { %1705 = vmatmul.mubr.msk.f32.gmra.mrb[10].mxu0 %vm909_vm3, %v532_v61 }
 0x119   : > { %1707 = vmatprep.mubr.msk.f32.mxu0 %vm909_vm3, %v533_v62 }
 0x11a   : > { %1667 = vmatmul.mubr.msk.f32.gmra.mrb[26].mxu1 %vm587_vm2, %v572_v63 }
 0x11b   : > { %1669 = vmatprep.mubr.msk.f32.mxu1 %vm587_vm2, %v573_v0 }
 0x11c   : > { %1708 = vmatmul.mubr.msk.f32.gmra.mrb[12].mxu0 %vm909_vm3, %v534_v1 }
 0x11d   : > { %1710 = vmatprep.mubr.msk.f32.mxu0 %vm909_vm3, %v535_v2 }
 0x11e   : > { %1670 = vmatmul.mubr.msk.f32.gmra.mrb[28].mxu1 %vm587_vm2, %v574_v3 }
 0x11f   : > { %1672 = vmatprep.mubr.msk.f32.mxu1 %vm587_vm2, %v575_v4 }
 0x120   : > { %1711 = vmatmul.mubr.msk.f32.gmra.mrb[14].mxu0 %vm909_vm3, %v536_v5 }
 0x121   : > { %1713 = vmatprep.mubr.msk.f32.mxu0 %vm909_vm3, %v537_v6 }
 0x122   : > { %1673 = vmatmul.mubr.msk.f32.gmra.mrb[30].mxu1 %vm587_vm2, %v576_v7 }
 0x123   : > { %1675 = vmatprep.mubr.msk.f32.mxu1 %vm587_vm2, %v577_v8 }
 0x124   : > { %1714 = vmatmul.mubr.msk.f32.gmra.mrb[16].mxu0 %vm909_vm3, %v538_v9 }
 0x125   : > { %1716 = vmatprep.mubr.msk.f32.mxu0 %vm909_vm3, %v539_v10 }
 0x126   : > { %1676 = vmatmul.mubr.msk.f32.gmra.mrb[32].mxu1 %vm587_vm2, %v578_v11 }
 0x127   : > { %1678 = vmatprep.mubr.msk.f32.mxu1 %vm587_vm2, %v579_v12 }
 0x128   : > { %1717 = vmatmul.mubr.msk.f32.gmra.mrb[18].mxu0 %vm909_vm3, %v540_v13 }
 0x129   : > { %1719 = vmatprep.mubr.msk.f32.mxu0 %vm909_vm3, %v541_v14 }
 0x12a   : > { %1679 = vmatmul.mubr.msk.f32.gmra.mrb[34].mxu1 %vm587_vm2, %v580_v15 }
 0x12b   : > { %1681 = vmatprep.mubr.msk.f32.mxu1 %vm587_vm2, %v581_v16 }
 0x12c   : > { %1720 = vmatmul.mubr.msk.f32.gmra.mrb[20].mxu0 %vm909_vm3, %v542_v17 }
 0x12d   : > { %1722 = vmatprep.mubr.msk.f32.mxu0 %vm909_vm3, %v543_v18 }
 0x12e   : > { %1682 = vmatmul.mubr.msk.f32.gmra.mrb[36].mxu1 %vm587_vm2, %v582_v19 }
 0x12f   : > { %1684 = vmatprep.mubr.msk.f32.mxu1 %vm587_vm2, %v583_v20 }
 0x130   : > { %1723 = vmatmul.mubr.msk.f32.gmra.mrb[22].mxu0 %vm909_vm3, %v544_v21 }
 0x131   : > { %1725 = vmatprep.mubr.msk.f32.mxu0 %vm909_vm3, %v545_v22 }
 0x132   : > { %1685 = vmatmul.mubr.msk.f32.gmra.mrb[38].mxu1 %vm587_vm2, %v584_v23 }
 0x133   : > { %1687 = vmatprep.mubr.msk.f32.mxu1 %vm587_vm2, %v585_v24 }
 0x134   : > { %1726 = vmatmul.mubr.msk.f32.gmra.mrb[24].mxu0 %vm909_vm3, %v546_v25 }
 0x135   : > { %1728 = vmatprep.mubr.msk.f32.mxu0 %vm909_vm3, %v547_v26 }
 0x136   : > { %1688 = vmatmul.mubr.msk.f32.gmra.mrb[40].mxu1 %vm587_vm2, %v586_v27 }
 0x138   : > { %1729 = vmatmul.mubr.msk.f32.gmra.mrb[26].mxu0 %vm909_vm3, %v548_v28 }
 0x139   : > { %1731 = vmatprep.mubr.msk.f32.mxu0 %vm909_vm3, %v549_v29 }
 0x13c   : > { %1732 = vmatmul.mubr.msk.f32.gmra.mrb[28].mxu0 %vm909_vm3, %v550_v30 }
 0x13d   : > { %1734 = vmatprep.mubr.msk.f32.mxu0 %vm909_vm3, %v551_v31 }
 0x140   : > { %1735 = vmatmul.mubr.msk.f32.gmra.mrb[30].mxu0 %vm909_vm3, %v552_v32 }
 0x141   : > { %1737 = vmatprep.mubr.msk.f32.mxu0 %vm909_vm3, %v553_v33 }
 0x144   : > { %1738 = vmatmul.mubr.msk.f32.gmra.mrb[32].mxu0 %vm909_vm3, %v554_v34 }
 0x1d5   : > { %v1650_v35 = vpop.f32.mrb[14].mxu1 }
 0x1d6   : > { %v770_v36 = vpop.f32.mrb[15].mxu1 }
 0x1d9   : > { %v1653_v38 = vpop.f32.mrb[16].mxu1 }
 0x1da   : > { %v780_v39 = vpop.f32.mrb[17].mxu1 }
 0x1db   : > { %v1694_v40 = vpop.f32.mrb[2].mxu0 }
 0x1dc   : > { %v1239_v41 = vadd.f32 %v1694_v40, %v2226_v37  ;;  %v1072_v42 = vpop.f32.mrb[3].mxu0 }
 0x1dd   : > { %v1238_v43 = vadd.f32 %v2226_v37, %v1072_v42  ;;  %v1656_v44 = vpop.f32.mrb[18].mxu1 }
 0x1de   : > { %1272 = vst.msk [vmem:[%s2231_s20 + $0x8] sm:$0xff] %vm1270_vm4, %v1239_v41  ;;  %v790_v45 = vpop.f32.mrb[19].mxu1 }
 0x1df   : > { %1271 = vst.msk [vmem:[%s2231_s20] sm:$0xff] %vm1270_vm4, %v1238_v43  ;;  %v1697_v46 = vpop.f32.mrb[4].mxu0 }
 0x1e0   : > { %v1241_v47 = vadd.f32 %v1697_v46, %v2226_v37  ;;  %v1082_v48 = vpop.f32.mrb[5].mxu0 }
 0x1e1   : > { %v1240_v49 = vadd.f32 %v2226_v37, %v1082_v48  ;;  %v1659_v50 = vpop.f32.mrb[20].mxu1 }
 0x1e2   : > { %1274 = vst.msk [vmem:[%s2231_s20 + $0x18] sm:$0xff] %vm1270_vm4, %v1241_v47  ;;  %v800_v51 = vpop.f32.mrb[21].mxu1 }
 0x1e3   : > { %1273 = vst.msk [vmem:[%s2231_s20 + $0x10] sm:$0xff] %vm1270_vm4, %v1240_v49  ;;  %v1700_v52 = vpop.f32.mrb[6].mxu0 }
 0x1e4   : > { %v1098_v53 = vadd.f32 %v1700_v52, %v1650_v35  ;;  %v1092_v54 = vpop.f32.mrb[7].mxu0 }
 0x1e5   : > { %v1093_v55 = vadd.f32 %v1092_v54, %v770_v36  ;;  %v1662_v56 = vpop.f32.mrb[22].mxu1 }
 0x1e6   : > { %v1243_v57 = vadd.f32 %v2226_v37, %v1098_v53  ;;  %v810_v58 = vpop.f32.mrb[23].mxu1 }
 0x1e7   : > { %v1242_v59 = vadd.f32 %v2226_v37, %v1093_v55  ;;  %v1703_v60 = vpop.f32.mrb[8].mxu0 }
 0x1e8   : > { %1276 = vst.msk [vmem:[%s2231_s20 + $0x28] sm:$0xff] %vm1270_vm4, %v1243_v57  ;;  %v1108_v61 = vadd.f32 %v1703_v60, %v1653_v38  ;;  %v1102_v62 = vpop.f32.mrb[9].mxu0 }
 0x1e9   : > { %1275 = vst.msk [vmem:[%s2231_s20 + $0x20] sm:$0xff] %vm1270_vm4, %v1242_v59  ;;  %v1103_v63 = vadd.f32 %v1102_v62, %v780_v39  ;;  %v1665_v0 = vpop.f32.mrb[24].mxu1 }
 0x1ea   : > { %v1245_v1 = vadd.f32 %v2226_v37, %v1108_v61  ;;  %v820_v2 = vpop.f32.mrb[25].mxu1 }
 0x1eb   : > { %v1244_v3 = vadd.f32 %v2226_v37, %v1103_v63  ;;  %v1706_v4 = vpop.f32.mrb[10].mxu0 }
 0x1ec   : > { %1278 = vst.msk [vmem:[%s2231_s20 + $0x38] sm:$0xff] %vm1270_vm4, %v1245_v1  ;;  %v1118_v5 = vadd.f32 %v1706_v4, %v1656_v44  ;;  %v1112_v6 = vpop.f32.mrb[11].mxu0 }
 0x1ed   : > { %1277 = vst.msk [vmem:[%s2231_s20 + $0x30] sm:$0xff] %vm1270_vm4, %v1244_v3  ;;  %v1113_v7 = vadd.f32 %v1112_v6, %v790_v45  ;;  %v1668_v8 = vpop.f32.mrb[26].mxu1 }
 0x1ee   : > { %v1247_v9 = vadd.f32 %v2226_v37, %v1118_v5  ;;  %v830_v10 = vpop.f32.mrb[27].mxu1 }
 0x1ef   : > { %v1246_v11 = vadd.f32 %v2226_v37, %v1113_v7  ;;  %v1709_v12 = vpop.f32.mrb[12].mxu0 }
 0x1f0   : > { %1280 = vst.msk [vmem:[%s2231_s20 + $0x48] sm:$0xff] %vm1270_vm4, %v1247_v9  ;;  %v1128_v13 = vadd.f32 %v1709_v12, %v1659_v50  ;;  %v1122_v14 = vpop.f32.mrb[13].mxu0 }
 0x1f1   : > { %1279 = vst.msk [vmem:[%s2231_s20 + $0x40] sm:$0xff] %vm1270_vm4, %v1246_v11  ;;  %v1123_v15 = vadd.f32 %v1122_v14, %v800_v51  ;;  %v1671_v16 = vpop.f32.mrb[28].mxu1 }
 0x1f2   : > { %v1249_v17 = vadd.f32 %v2226_v37, %v1128_v13  ;;  %v840_v18 = vpop.f32.mrb[29].mxu1 }
 0x1f3   : > { %v1248_v19 = vadd.f32 %v2226_v37, %v1123_v15  ;;  %v1712_v20 = vpop.f32.mrb[14].mxu0 }
 0x1f4   : > { %1282 = vst.msk [vmem:[%s2231_s20 + $0x58] sm:$0xff] %vm1270_vm4, %v1249_v17  ;;  %v1138_v21 = vadd.f32 %v1712_v20, %v1662_v56  ;;  %v1132_v22 = vpop.f32.mrb[15].mxu0 }
 0x1f5   : > { %1281 = vst.msk [vmem:[%s2231_s20 + $0x50] sm:$0xff] %vm1270_vm4, %v1248_v19  ;;  %v1133_v23 = vadd.f32 %v1132_v22, %v810_v58  ;;  %v1674_v24 = vpop.f32.mrb[30].mxu1 }
 0x1f6   : > { %v1251_v25 = vadd.f32 %v2226_v37, %v1138_v21  ;;  %v850_v26 = vpop.f32.mrb[31].mxu1 }
 0x1f7   : > { %v1250_v27 = vadd.f32 %v2226_v37, %v1133_v23  ;;  %v1715_v28 = vpop.f32.mrb[16].mxu0 }
 0x1f8   : > { %1284 = vst.msk [vmem:[%s2231_s20 + $0x68] sm:$0xff] %vm1270_vm4, %v1251_v25  ;;  %v1148_v29 = vadd.f32 %v1715_v28, %v1665_v0  ;;  %v1142_v30 = vpop.f32.mrb[17].mxu0 }
 0x1f9   : > { %1283 = vst.msk [vmem:[%s2231_s20 + $0x60] sm:$0xff] %vm1270_vm4, %v1250_v27  ;;  %v1143_v31 = vadd.f32 %v1142_v30, %v820_v2  ;;  %v1677_v32 = vpop.f32.mrb[32].mxu1 }
 0x1fa   : > { %v1253_v33 = vadd.f32 %v2226_v37, %v1148_v29  ;;  %v860_v34 = vpop.f32.mrb[33].mxu1 }
 0x1fb   : > { %v1252_v35 = vadd.f32 %v2226_v37, %v1143_v31  ;;  %v1718_v36 = vpop.f32.mrb[18].mxu0 }
 0x1fc   : > { %1286 = vst.msk [vmem:[%s2231_s20 + $0x78] sm:$0xff] %vm1270_vm4, %v1253_v33  ;;  %v1158_v38 = vadd.f32 %v1718_v36, %v1668_v8  ;;  %v1152_v39 = vpop.f32.mrb[19].mxu0 }
 0x1fd   : > { %1285 = vst.msk [vmem:[%s2231_s20 + $0x70] sm:$0xff] %vm1270_vm4, %v1252_v35  ;;  %v1153_v40 = vadd.f32 %v1152_v39, %v830_v10  ;;  %v1680_v41 = vpop.f32.mrb[34].mxu1 }
 0x1fe   : > { %v1255_v42 = vadd.f32 %v2226_v37, %v1158_v38  ;;  %v870_v43 = vpop.f32.mrb[35].mxu1 }
 0x1ff   : > { %v1254_v44 = vadd.f32 %v2226_v37, %v1153_v40  ;;  %v1721_v45 = vpop.f32.mrb[20].mxu0 }
 0x200   : > { %1288 = vst.msk [vmem:[%s2231_s20 + $0x88] sm:$0xff] %vm1270_vm4, %v1255_v42  ;;  %v1168_v46 = vadd.f32 %v1721_v45, %v1671_v16  ;;  %v1162_v47 = vpop.f32.mrb[21].mxu0 }
 0x201   : > { %1287 = vst.msk [vmem:[%s2231_s20 + $0x80] sm:$0xff] %vm1270_vm4, %v1254_v44  ;;  %v1163_v48 = vadd.f32 %v1162_v47, %v840_v18  ;;  %v1683_v49 = vpop.f32.mrb[36].mxu1 }
 0x202   : > { %v1257_v50 = vadd.f32 %v2226_v37, %v1168_v46  ;;  %v880_v51 = vpop.f32.mrb[37].mxu1 }
 0x203   : > { %v1256_v52 = vadd.f32 %v2226_v37, %v1163_v48  ;;  %v1724_v53 = vpop.f32.mrb[22].mxu0 }
 0x204   : > { %1290 = vst.msk [vmem:[%s2231_s20 + $0x98] sm:$0xff] %vm1270_vm4, %v1257_v50  ;;  %v1178_v54 = vadd.f32 %v1724_v53, %v1674_v24  ;;  %v1172_v55 = vpop.f32.mrb[23].mxu0 }
 0x205   : > { %1289 = vst.msk [vmem:[%s2231_s20 + $0x90] sm:$0xff] %vm1270_vm4, %v1256_v52  ;;  %v1173_v56 = vadd.f32 %v1172_v55, %v850_v26  ;;  %v1686_v57 = vpop.f32.mrb[38].mxu1 }
 0x206   : > { %v1259_v58 = vadd.f32 %v2226_v37, %v1178_v54  ;;  %v890_v59 = vpop.f32.mrb[39].mxu1 }
 0x207   : > { %v1258_v60 = vadd.f32 %v2226_v37, %v1173_v56  ;;  %v1727_v61 = vpop.f32.mrb[24].mxu0 }
 0x208   : > { %1292 = vst.msk [vmem:[%s2231_s20 + $0xa8] sm:$0xff] %vm1270_vm4, %v1259_v58  ;;  %v1188_v62 = vadd.f32 %v1727_v61, %v1677_v32  ;;  %v1182_v63 = vpop.f32.mrb[25].mxu0 }
 0x209   : > { %1291 = vst.msk [vmem:[%s2231_s20 + $0xa0] sm:$0xff] %vm1270_vm4, %v1258_v60  ;;  %v1183_v0 = vadd.f32 %v1182_v63, %v860_v34  ;;  %v1689_v1 = vpop.f32.mrb[40].mxu1 }
 0x20a   : > { %v1261_v2 = vadd.f32 %v2226_v37, %v1188_v62  ;;  %v900_v3 = vpop.f32.mrb[41].mxu1 }
 0x20b   : > { %v1260_v4 = vadd.f32 %v2226_v37, %v1183_v0  ;;  %v1730_v5 = vpop.f32.mrb[26].mxu0 }
 0x20c   : > { %1294 = vst.msk [vmem:[%s2231_s20 + $0xb8] sm:$0xff] %vm1270_vm4, %v1261_v2  ;;  %v1198_v6 = vadd.f32 %v1730_v5, %v1680_v41  ;;  %v1192_v7 = vpop.f32.mrb[27].mxu0 }
 0x20d   : > { %1293 = vst.msk [vmem:[%s2231_s20 + $0xb0] sm:$0xff] %vm1270_vm4, %v1260_v4  ;;  %v1193_v8 = vadd.f32 %v1192_v7, %v870_v43 }
 0x20e   : > { %v1263_v9 = vadd.f32 %v2226_v37, %v1198_v6 }
 0x20f   : > { %v1262_v10 = vadd.f32 %v2226_v37, %v1193_v8  ;;  %v1733_v11 = vpop.f32.mrb[28].mxu0 }
 0x210   : > { %1296 = vst.msk [vmem:[%s2231_s20 + $0xc8] sm:$0xff] %vm1270_vm4, %v1263_v9  ;;  %v1208_v12 = vadd.f32 %v1733_v11, %v1683_v49  ;;  %v1202_v13 = vpop.f32.mrb[29].mxu0 }
 0x211   : > { %1295 = vst.msk [vmem:[%s2231_s20 + $0xc0] sm:$0xff] %vm1270_vm4, %v1262_v10  ;;  %v1203_v14 = vadd.f32 %v1202_v13, %v880_v51 }
 0x212   : > { %v1265_v15 = vadd.f32 %v2226_v37, %v1208_v12 }
 0x213   : > { %v1264_v16 = vadd.f32 %v2226_v37, %v1203_v14  ;;  %v1736_v17 = vpop.f32.mrb[30].mxu0 }
 0x214   : > { %1298 = vst.msk [vmem:[%s2231_s20 + $0xd8] sm:$0xff] %vm1270_vm4, %v1265_v15  ;;  %v1218_v18 = vadd.f32 %v1736_v17, %v1686_v57  ;;  %v1212_v19 = vpop.f32.mrb[31].mxu0 }
 0x215   : > { %1297 = vst.msk [vmem:[%s2231_s20 + $0xd0] sm:$0xff] %vm1270_vm4, %v1264_v16  ;;  %v1213_v20 = vadd.f32 %v1212_v19, %v890_v59 }
 0x216   : > { %v1267_v21 = vadd.f32 %v2226_v37, %v1218_v18 }
 0x217   : > { %v1266_v22 = vadd.f32 %v2226_v37, %v1213_v20  ;;  %v1739_v23 = vpop.f32.mrb[32].mxu0 }
 0x218   : > { %1300 = vst.msk [vmem:[%s2231_s20 + $0xe8] sm:$0xff] %vm1270_vm4, %v1267_v21  ;;  %v1228_v24 = vadd.f32 %v1739_v23, %v1689_v1  ;;  %v1222_v25 = vpop.f32.mrb[33].mxu0 }
 0x219   : > { %1299 = vst.msk [vmem:[%s2231_s20 + $0xe0] sm:$0xff] %vm1270_vm4, %v1266_v22  ;;  %v1223_v26 = vadd.f32 %v1222_v25, %v900_v3 }
 0x21a   : > { %v1269_v27 = vadd.f32 %v2226_v37, %v1228_v24 }
 0x21b   : > { %v1268_v28 = vadd.f32 %v2226_v37, %v1223_v26 }
 0x21c   : > { %1302 = vst.msk [vmem:[%s2231_s20 + $0xf8] sm:$0xff] %vm1270_vm4, %v1269_v27 }
 0x21d   : > { %1301 = vst.msk [vmem:[%s2231_s20 + $0xf0] sm:$0xff] %vm1270_vm4, %v1268_v28 }
 0x21e PF: > { %s16_s23 = sadd.s32 1, %s1853_s23   ;;  %s2345_s21 = smov %s1849_s22 }
 0x21f   : > { %p13_p5 = scmp.ge.s32.totalorder %s16_s23, 4   ;;  %s2346_s22 = smov %s2348_s24 }
 0x221   :  { %15 = sbr.rel (!%p13_p5) target bundleno = 2 (0x2), region = 80 }

</bundles_post_ra>
